<compile_context>
chip_gen: v5e
topology: v5e:2x2
jax: 0.10.0
libtpu: 0.0.40
codegen_flags: <defaults>
</compile_context>

<pallas_src>
import functools

import jax
import jax.numpy as jnp
from jax import lax
from jax.experimental import pallas as pl
from jax.experimental.pallas import tpu as pltpu


# ---------------------------------------------------------------------------
# Pallas kernel: the full ResPath chain for one batch element (one grid step)
# ---------------------------------------------------------------------------
def _respath_chain_kernel(x_ref, *rest, H, W, cins, cout):
    """rest = [wband_0, bcat_0, ..., wband_{L-1}, bcat_{L-1}, out_ref, xpad_ref]

    wband_b : (3, (W+2)*cin_b, 2*W*cout) bf16 banded weights (dy = vertical tap)
              cols [0, W*cout)        = BN-folded 3x3 conv, pixel w -> col w*cout+o
              cols [W*cout, 2*W*cout) = BN-folded 1x1 shortcut (dy=1 only)
    bcat_b  : (1, 2*W*cout) f32 == [tile(b3, W) | tile(b1, W)]
    xpad_ref: (H+2, (W+2)*cmax) f32 persistent zero-halo staging buffer
    """
    length = len(cins)
    w_refs = rest[:2 * length]
    out_ref = rest[2 * length]
    xpad_ref = rest[2 * length + 1]

    # Zero only the top/bottom halo rows each grid step (nothing below ever
    # writes rows 0 or H+1).  Not gated on program_id==0: under megacore
    # splitting each core has a private scratch and may never run step 0.
    zrow = jnp.zeros((1, xpad_ref.shape[1]), xpad_ref.dtype)
    xpad_ref[0:1, :] = zrow
    xpad_ref[H + 1:H + 2, :] = zrow

    x = x_ref[0]                                   # (H, W*cin0) f32, (W,C)-on-lanes
    out = None
    for blk in range(length):
        cin = cins[blk]
        wband_ref = w_refs[2 * blk]                # (3, (W+2)*cin, 2*W*cout) bf16
        bcat = w_refs[2 * blk + 1][...]            # (1, 2*W*cout) f32

        # Stage the activation inside the zero halo.  The 1-pixel left/right
        # halo strips are rewritten per block: a wider earlier block (or a
        # previous grid step) may have stored data there (scratch persists).
        zcol = jnp.zeros((H, cin), xpad_ref.dtype)
        xpad_ref[1:H + 1, 0:cin] = zcol
        xpad_ref[1:H + 1, (W + 1) * cin:(W + 2) * cin] = zcol
        xpad_ref[1:H + 1, cin:(W + 1) * cin] = x   # lane-dense (H, W*cin) store

        # Three banded matmuls (one per vertical tap): bf16 in, f32 accumulate.
        acc = None
        for dy in range(3):
            slab = xpad_ref[dy:dy + H, 0:(W + 2) * cin].astype(jnp.bfloat16)
            part = jnp.dot(slab, wband_ref[dy], preferred_element_type=jnp.float32)
            acc = part if acc is None else acc + part

        y = acc + bcat                             # (H, 2*W*cout) f32
        conv3 = y[:, 0:W * cout]                   # BN-folded 3x3 conv branch
        short = y[:, W * cout:2 * W * cout]        # BN-folded 1x1 shortcut (no activation)
        out = jnp.maximum(jnp.maximum(conv3, 0.0) + short, 0.0)   # relu(relu(conv)+shortcut)
        if blk + 1 < length:
            x = out                                # stays lane-dense for the next block

    out_ref[0] = out.astype(out_ref.dtype)         # lane-dense (H, W*cout) store


# ---------------------------------------------------------------------------
# Wrapper (accepts NCHW like the PyTorch module)
# ---------------------------------------------------------------------------
def respath_forward_pallas(x_nchw, params):
    x = jnp.transpose(x_nchw, (0, 2, 3, 1)).astype(jnp.float32)   # NCHW -> NHWC
    B, H, W, cin0 = x.shape
    x = x.reshape(B, H, W * cin0)                                  # (W,C)-on-lanes; free reshape

    cout = params[0]["wband"].shape[2] // (2 * W)
    cins = tuple(p["wband"].shape[1] // (W + 2) for p in params)
    cmax = max(cins + (cout,))

    kernel = functools.partial(_respath_chain_kernel, H=H, W=W, cins=cins, cout=cout)

    in_specs = [pl.BlockSpec((1, H, W * cin0), lambda b: (b, 0, 0))]
    weight_args = []
    for p in params:
        wband, bcat = p["wband"], p["bcat"]
        weight_args += [wband, bcat]
        # Weights are tiny and grid-invariant: full block, constant index_map.
        in_specs.append(pl.BlockSpec(wband.shape, lambda b: (0, 0, 0)))
        in_specs.append(pl.BlockSpec(bcat.shape, lambda b: (0, 0)))

    grid_spec = pltpu.PrefetchScalarGridSpec(
        num_scalar_prefetch=0,
        grid=(B,),                                   # one image per grid step
        in_specs=in_specs,
        out_specs=pl.BlockSpec((1, H, W * cout), lambda b: (b, 0, 0)),
        scratch_shapes=[
            pltpu.VMEM((H + 2, (W + 2) * cmax), jnp.float32),   # zero-halo activation staging
        ],
    )

    y = pl.pallas_call(
        kernel,
        out_shape=jax.ShapeDtypeStruct((B, H, W * cout), jnp.float32),
        grid_spec=grid_spec,
        compiler_params=pltpu.CompilerParams(
            dimension_semantics=("parallel",),        # v7x: batch grid split across both TCs
        ),
    )(x, *weight_args)

    y = y.reshape(B, H, W, cout)                      # contiguous reshape in XLA (free)
    return jnp.transpose(y, (0, 3, 1, 2))             # NHWC -> NCHW


# ---------------------------------------------------------------------------
# Parameter construction (PyTorch-like init) + eval-mode BN folding
# ---------------------------------------------------------------------------
def _init_convbn(key, cin, cout, k):
    """(OIHW conv weight, bias) with eval-mode BatchNorm folded in."""
    kw_key, kb_key = jax.random.split(key)
    fan_in = cin * k * k
    bound = 1.0 / jnp.sqrt(fan_in)
    w = jax.random.uniform(kw_key, (cout, cin, k, k), jnp.float32, -bound, bound)
    b = jax.random.uniform(kb_key, (cout,), jnp.float32, -bound, bound)
    # Fresh BatchNorm2d (eval mode): gamma=1, beta=0, running_mean=0, running_var=1.
    gamma = jnp.ones((cout,), jnp.float32)
    beta = jnp.zeros((cout,), jnp.float32)
    mean = jnp.zeros((cout,), jnp.float32)
    var = jnp.ones((cout,), jnp.float32)
    eps = 1e-5
    scale = gamma / jnp.sqrt(var + eps)
    return w * scale[:, None, None, None], (b - mean) * scale + beta


def _make_banded_weights(w3_oihw, w1_oihw, W):
    """Banded (Toeplitz) weights for the lane-dense (W,C)-on-lanes matmul.

    Returns (3, (W+2)*cin, 2*W*cout) f32:
      [dy, (w+dx)*cin + c, w*cout + o]          = w3[o, c, dy, dx]
      [1,  (w+1)*cin + c, W*cout + w*cout + o]  = w1[o, c, 0, 0]
    """
    cout, cin = w3_oihw.shape[0], w3_oihw.shape[1]
    w3 = jnp.transpose(w3_oihw, (2, 3, 1, 0))          # (ky, kx, cin, cout)
    w1 = jnp.transpose(w1_oihw[:, :, 0, 0], (1, 0))    # (cin, cout)
    wband = jnp.zeros((3, (W + 2) * cin, 2 * W * cout), jnp.float32)
    for w in range(W):
        for dx in range(3):
            wband = wband.at[:, (w + dx) * cin:(w + dx + 1) * cin,
                             w * cout:(w + 1) * cout].set(w3[:, dx])
        wband = wband.at[1, (w + 1) * cin:(w + 2) * cin,
                         W * cout + w * cout:W * cout + (w + 1) * cout].set(w1)
    return wband


def make_respath_params(key, in_channels, filters, length, W):
    params = []
    cin = in_channels
    for _ in range(length):
        key, k1, k2 = jax.random.split(key, 3)
        w1_oihw, b1 = _init_convbn(k1, cin, filters, 1)   # 1x1 shortcut ConvBN
        w3_oihw, b3 = _init_convbn(k2, cin, filters, 3)   # 3x3 main ConvBN
        # bf16-quantized weights feed the MXU; the reference uses the same
        # quantized values so the check isolates activation rounding only.
        w1_q = w1_oihw.astype(jnp.bfloat16).astype(jnp.float32)
        w3_q = w3_oihw.astype(jnp.bfloat16).astype(jnp.float32)
        wband = _make_banded_weights(w3_q, w1_q, W).astype(jnp.bfloat16)
        bcat = jnp.concatenate([jnp.tile(b3, W), jnp.tile(b1, W)]).reshape(1, 2 * W * filters)
        params.append(dict(
            wband=wband,                   # (3, (W+2)*cin, 2*W*filters) bf16
            bcat=bcat,                     # (1, 2*W*filters) f32
            w3_ref=w3_q, b3_ref=b3, w1_ref=w1_q, b1_ref=b1,
        ))
        cin = filters
    return params


# ---------------------------------------------------------------------------
# Pure-JAX reference (lax.conv) for correctness
# ---------------------------------------------------------------------------
def respath_forward_ref(x_nchw, params):
    def conv(inp, w_oihw, b, pad):
        y = lax.conv_general_dilated(
            inp, w_oihw, window_strides=(1, 1),
            padding=[(pad, pad), (pad, pad)],
            dimension_numbers=("NCHW", "OIHW", "NCHW"),
            precision=lax.Precision.HIGHEST)
        return y + b[None, :, None, None]

    x = x_nchw
    for p in params:
        shortcut = conv(x, p["w1_ref"], p["b1_ref"], 0)
        out = jax.nn.relu(conv(x, p["w3_ref"], p["b3_ref"], 1))
        x = jax.nn.relu(out + shortcut)
    return x


if __name__ == "__main__":
    B, in_channels, H, W = 2, 4, 16, 16
    filters, length = 8, 3

    key = jax.random.PRNGKey(0)
    kx, kp = jax.random.split(key)
    x = jax.random.normal(kx, (B, in_channels, H, W), jnp.float32)
    params = make_respath_params(kp, in_channels, filters, length, W)

    y = jax.block_until_ready(jax.jit(respath_forward_pallas)(x, params))
    y_ref = respath_forward_ref(x, params)

    assert y.shape == (B, filters, H, W)
    max_err = float(jnp.max(jnp.abs(y - y_ref)))
    assert jnp.allclose(y, y_ref, atol=5e-2, rtol=5e-2), \
        f"mismatch vs reference (max abs err {max_err})"

    print("KERNEL_OK")
</pallas_src>

<mosaic_0001>
module attributes {stable_mosaic.version = 11 : i64} {
  func.func @_respath_chain_kernel(%arg0: i32, %arg1: memref<1x16x64xf32, #tpu.memory_space<vmem>>, %arg2: memref<3x72x256xbf16, #tpu.memory_space<vmem>>, %arg3: memref<1x256xf32, #tpu.memory_space<vmem>>, %arg4: memref<3x144x256xbf16, #tpu.memory_space<vmem>>, %arg5: memref<1x256xf32, #tpu.memory_space<vmem>>, %arg6: memref<3x144x256xbf16, #tpu.memory_space<vmem>>, %arg7: memref<1x256xf32, #tpu.memory_space<vmem>>, %arg8: memref<1x16x128xf32, #tpu.memory_space<vmem>>, %arg9: memref<18x144xf32, #tpu.memory_space<vmem>>) attributes {dimension_semantics = [#tpu.dimension_semantics<parallel>], iteration_bounds = array<i64: 2>, scalar_prefetch = 0 : i64, scratch_operands = 1 : i64, tpu.core_type = #tpu.core_type<tc>, window_params = [{transform_indices = @transform_0, window_bounds = array<i64: 1, 16, 64>}, {pipeline_mode = #tpu.pipeline_mode<synchronous>, transform_indices = @transform_1, window_bounds = array<i64: 3, 72, 256>}, {pipeline_mode = #tpu.pipeline_mode<synchronous>, transform_indices = @transform_2, window_bounds = array<i64: 1, 256>}, {pipeline_mode = #tpu.pipeline_mode<synchronous>, transform_indices = @transform_3, window_bounds = array<i64: 3, 144, 256>}, {pipeline_mode = #tpu.pipeline_mode<synchronous>, transform_indices = @transform_4, window_bounds = array<i64: 1, 256>}, {pipeline_mode = #tpu.pipeline_mode<synchronous>, transform_indices = @transform_5, window_bounds = array<i64: 3, 144, 256>}, {pipeline_mode = #tpu.pipeline_mode<synchronous>, transform_indices = @transform_6, window_bounds = array<i64: 1, 256>}, {transform_indices = @transform_7, window_bounds = array<i64: 1, 16, 128>}]} {
    %cst = arith.constant 0.000000e+00 : f32
    %0 = vector.broadcast %cst : f32 to vector<1x144xf32>
    %c0 = arith.constant 0 : index
    %c0_0 = arith.constant 0 : index
    %1 = vector.load %arg9[%c0, %c0_0] : memref<18x144xf32, #tpu.memory_space<vmem>>, vector<1x144xf32>
    tpu.vector_store %arg9[%c0, %c0_0], %0 {strides = array<i32>} : memref<18x144xf32, #tpu.memory_space<vmem>>, vector<1x144xf32>,
    %c17 = arith.constant 17 : index
    %c0_1 = arith.constant 0 : index
    %2 = vector.load %arg9[%c17, %c0_1] : memref<18x144xf32, #tpu.memory_space<vmem>>, vector<1x144xf32>
    tpu.vector_store %arg9[%c17, %c0_1], %0 {strides = array<i32>} : memref<18x144xf32, #tpu.memory_space<vmem>>, vector<1x144xf32>,
    %c0_2 = arith.constant 0 : index
    %c0_3 = arith.constant 0 : index
    %c0_4 = arith.constant 0 : index
    %3 = vector.load %arg1[%c0_2, %c0_3, %c0_4] : memref<1x16x64xf32, #tpu.memory_space<vmem>>, vector<1x16x64xf32>
    %4 = vector.shape_cast %3 : vector<1x16x64xf32> to vector<16x64xf32>
    %c0_5 = arith.constant 0 : index
    %c0_6 = arith.constant 0 : index
    %5 = vector.load %arg3[%c0_5, %c0_6] : memref<1x256xf32, #tpu.memory_space<vmem>>, vector<1x256xf32>
    %cst_7 = arith.constant 0.000000e+00 : f32
    %6 = vector.broadcast %cst_7 : f32 to vector<16x4xf32>
    %c1 = arith.constant 1 : index
    %c0_8 = arith.constant 0 : index
    %7 = vector.load %arg9[%c1, %c0_8] : memref<18x144xf32, #tpu.memory_space<vmem>>, vector<16x4xf32>
    tpu.vector_store %arg9[%c1, %c0_8], %6 {strides = array<i32>} : memref<18x144xf32, #tpu.memory_space<vmem>>, vector<16x4xf32>,
    %c1_9 = arith.constant 1 : index
    %c68 = arith.constant 68 : index
    %8 = vector.load %arg9[%c1_9, %c68] : memref<18x144xf32, #tpu.memory_space<vmem>>, vector<16x4xf32>
    tpu.vector_store %arg9[%c1_9, %c68], %6 {strides = array<i32>} : memref<18x144xf32, #tpu.memory_space<vmem>>, vector<16x4xf32>,
    %c1_10 = arith.constant 1 : index
    %c4 = arith.constant 4 : index
    %9 = vector.load %arg9[%c1_10, %c4] : memref<18x144xf32, #tpu.memory_space<vmem>>, vector<16x64xf32>
    tpu.vector_store %arg9[%c1_10, %c4], %4 {strides = array<i32>} : memref<18x144xf32, #tpu.memory_space<vmem>>, vector<16x64xf32>,
    %c0_11 = arith.constant 0 : index
    %c0_12 = arith.constant 0 : index
    %10 = vector.load %arg9[%c0_11, %c0_12] : memref<18x144xf32, #tpu.memory_space<vmem>>, vector<16x72xf32>
    %11 = arith.truncf %10 : vector<16x72xf32> to vector<16x72xbf16>
    %c0_13 = arith.constant 0 : index
    %c0_14 = arith.constant 0 : index
    %c0_15 = arith.constant 0 : index
    %12 = vector.load %arg2[%c0_13, %c0_14, %c0_15] : memref<3x72x256xbf16, #tpu.memory_space<vmem>>, vector<1x72x256xbf16>
    %13 = vector.shape_cast %12 : vector<1x72x256xbf16> to vector<72x256xbf16>
    %cst_16 = arith.constant dense<0.000000e+00> : vector<16x256xf32>
    %14 = tpu.matmul %11, %13, %cst_16 {dimension_numbers = #tpu.dot_dimension_numbers<[1], [0], [0], [1], [0, 0, 1, 1], [], []>} : vector<16x72xbf16>, vector<72x256xbf16>, vector<16x256xf32> -> vector<16x256xf32>
    %c1_17 = arith.constant 1 : index
    %c0_18 = arith.constant 0 : index
    %15 = vector.load %arg9[%c1_17, %c0_18] : memref<18x144xf32, #tpu.memory_space<vmem>>, vector<16x72xf32>
    %16 = arith.truncf %15 : vector<16x72xf32> to vector<16x72xbf16>
    %c1_19 = arith.constant 1 : index
    %c0_20 = arith.constant 0 : index
    %c0_21 = arith.constant 0 : index
    %17 = vector.load %arg2[%c1_19, %c0_20, %c0_21] : memref<3x72x256xbf16, #tpu.memory_space<vmem>>, vector<1x72x256xbf16>
    %18 = vector.shape_cast %17 : vector<1x72x256xbf16> to vector<72x256xbf16>
    %cst_22 = arith.constant dense<0.000000e+00> : vector<16x256xf32>
    %19 = tpu.matmul %16, %18, %cst_22 {dimension_numbers = #tpu.dot_dimension_numbers<[1], [0], [0], [1], [0, 0, 1, 1], [], []>} : vector<16x72xbf16>, vector<72x256xbf16>, vector<16x256xf32> -> vector<16x256xf32>
    %20 = arith.addf %14, %19 : vector<16x256xf32>
    %c2 = arith.constant 2 : index
    %c0_23 = arith.constant 0 : index
    %21 = vector.load %arg9[%c2, %c0_23] : memref<18x144xf32, #tpu.memory_space<vmem>>, vector<16x72xf32>
    %22 = arith.truncf %21 : vector<16x72xf32> to vector<16x72xbf16>
    %c2_24 = arith.constant 2 : index
    %c0_25 = arith.constant 0 : index
    %c0_26 = arith.constant 0 : index
    %23 = vector.load %arg2[%c2_24, %c0_25, %c0_26] : memref<3x72x256xbf16, #tpu.memory_space<vmem>>, vector<1x72x256xbf16>
    %24 = vector.shape_cast %23 : vector<1x72x256xbf16> to vector<72x256xbf16>
    %cst_27 = arith.constant dense<0.000000e+00> : vector<16x256xf32>
    %25 = tpu.matmul %22, %24, %cst_27 {dimension_numbers = #tpu.dot_dimension_numbers<[1], [0], [0], [1], [0, 0, 1, 1], [], []>} : vector<16x72xbf16>, vector<72x256xbf16>, vector<16x256xf32> -> vector<16x256xf32>
    %26 = arith.addf %20, %25 : vector<16x256xf32>
    %27 = vector.broadcast %5 : vector<1x256xf32> to vector<16x256xf32>
    %28 = arith.addf %26, %27 : vector<16x256xf32>
    %29 = vector.extract_strided_slice %28 {offsets = [0, 0], sizes = [16, 128], strides = [1, 1]} : vector<16x256xf32> to vector<16x128xf32>
    %30 = vector.extract_strided_slice %28 {offsets = [0, 128], sizes = [16, 128], strides = [1, 1]} : vector<16x256xf32> to vector<16x128xf32>
    %cst_28 = arith.constant 0.000000e+00 : f32
    %31 = vector.broadcast %cst_28 : f32 to vector<16x128xf32>
    %32 = arith.maximumf %29, %31 : vector<16x128xf32>
    %33 = arith.addf %32, %30 : vector<16x128xf32>
    %cst_29 = arith.constant 0.000000e+00 : f32
    %34 = vector.broadcast %cst_29 : f32 to vector<16x128xf32>
    %35 = arith.maximumf %33, %34 : vector<16x128xf32>
    %c0_30 = arith.constant 0 : index
    %c0_31 = arith.constant 0 : index
    %36 = vector.load %arg5[%c0_30, %c0_31] : memref<1x256xf32, #tpu.memory_space<vmem>>, vector<1x256xf32>
    %cst_32 = arith.constant 0.000000e+00 : f32
    %37 = vector.broadcast %cst_32 : f32 to vector<16x8xf32>
    %c1_33 = arith.constant 1 : index
    %c0_34 = arith.constant 0 : index
    %38 = vector.load %arg9[%c1_33, %c0_34] : memref<18x144xf32, #tpu.memory_space<vmem>>, vector<16x8xf32>
    tpu.vector_store %arg9[%c1_33, %c0_34], %37 {strides = array<i32>} : memref<18x144xf32, #tpu.memory_space<vmem>>, vector<16x8xf32>,
    %c1_35 = arith.constant 1 : index
    %c136 = arith.constant 136 : index
    %39 = vector.load %arg9[%c1_35, %c136] : memref<18x144xf32, #tpu.memory_space<vmem>>, vector<16x8xf32>
    tpu.vector_store %arg9[%c1_35, %c136], %37 {strides = array<i32>} : memref<18x144xf32, #tpu.memory_space<vmem>>, vector<16x8xf32>,
    %c1_36 = arith.constant 1 : index
    %c8 = arith.constant 8 : index
    %40 = vector.load %arg9[%c1_36, %c8] : memref<18x144xf32, #tpu.memory_space<vmem>>, vector<16x128xf32>
    tpu.vector_store %arg9[%c1_36, %c8], %35 {strides = array<i32>} : memref<18x144xf32, #tpu.memory_space<vmem>>, vector<16x128xf32>,
    %c0_37 = arith.constant 0 : index
    %c0_38 = arith.constant 0 : index
    %41 = vector.load %arg9[%c0_37, %c0_38] : memref<18x144xf32, #tpu.memory_space<vmem>>, vector<16x144xf32>
    %42 = arith.truncf %41 : vector<16x144xf32> to vector<16x144xbf16>
    %c0_39 = arith.constant 0 : index
    %c0_40 = arith.constant 0 : index
    %c0_41 = arith.constant 0 : index
    %43 = vector.load %arg4[%c0_39, %c0_40, %c0_41] : memref<3x144x256xbf16, #tpu.memory_space<vmem>>, vector<1x144x256xbf16>
    %44 = vector.shape_cast %43 : vector<1x144x256xbf16> to vector<144x256xbf16>
    %cst_42 = arith.constant dense<0.000000e+00> : vector<16x256xf32>
    %45 = tpu.matmul %42, %44, %cst_42 {dimension_numbers = #tpu.dot_dimension_numbers<[1], [0], [0], [1], [0, 0, 1, 1], [], []>} : vector<16x144xbf16>, vector<144x256xbf16>, vector<16x256xf32> -> vector<16x256xf32>
    %c1_43 = arith.constant 1 : index
    %c0_44 = arith.constant 0 : index
    %46 = vector.load %arg9[%c1_43, %c0_44] : memref<18x144xf32, #tpu.memory_space<vmem>>, vector<16x144xf32>
    %47 = arith.truncf %46 : vector<16x144xf32> to vector<16x144xbf16>
    %c1_45 = arith.constant 1 : index
    %c0_46 = arith.constant 0 : index
    %c0_47 = arith.constant 0 : index
    %48 = vector.load %arg4[%c1_45, %c0_46, %c0_47] : memref<3x144x256xbf16, #tpu.memory_space<vmem>>, vector<1x144x256xbf16>
    %49 = vector.shape_cast %48 : vector<1x144x256xbf16> to vector<144x256xbf16>
    %cst_48 = arith.constant dense<0.000000e+00> : vector<16x256xf32>
    %50 = tpu.matmul %47, %49, %cst_48 {dimension_numbers = #tpu.dot_dimension_numbers<[1], [0], [0], [1], [0, 0, 1, 1], [], []>} : vector<16x144xbf16>, vector<144x256xbf16>, vector<16x256xf32> -> vector<16x256xf32>
    %51 = arith.addf %45, %50 : vector<16x256xf32>
    %c2_49 = arith.constant 2 : index
    %c0_50 = arith.constant 0 : index
    %52 = vector.load %arg9[%c2_49, %c0_50] : memref<18x144xf32, #tpu.memory_space<vmem>>, vector<16x144xf32>
    %53 = arith.truncf %52 : vector<16x144xf32> to vector<16x144xbf16>
    %c2_51 = arith.constant 2 : index
    %c0_52 = arith.constant 0 : index
    %c0_53 = arith.constant 0 : index
    %54 = vector.load %arg4[%c2_51, %c0_52, %c0_53] : memref<3x144x256xbf16, #tpu.memory_space<vmem>>, vector<1x144x256xbf16>
    %55 = vector.shape_cast %54 : vector<1x144x256xbf16> to vector<144x256xbf16>
    %cst_54 = arith.constant dense<0.000000e+00> : vector<16x256xf32>
    %56 = tpu.matmul %53, %55, %cst_54 {dimension_numbers = #tpu.dot_dimension_numbers<[1], [0], [0], [1], [0, 0, 1, 1], [], []>} : vector<16x144xbf16>, vector<144x256xbf16>, vector<16x256xf32> -> vector<16x256xf32>
    %57 = arith.addf %51, %56 : vector<16x256xf32>
    %58 = vector.broadcast %36 : vector<1x256xf32> to vector<16x256xf32>
    %59 = arith.addf %57, %58 : vector<16x256xf32>
    %60 = vector.extract_strided_slice %59 {offsets = [0, 0], sizes = [16, 128], strides = [1, 1]} : vector<16x256xf32> to vector<16x128xf32>
    %61 = vector.extract_strided_slice %59 {offsets = [0, 128], sizes = [16, 128], strides = [1, 1]} : vector<16x256xf32> to vector<16x128xf32>
    %cst_55 = arith.constant 0.000000e+00 : f32
    %62 = vector.broadcast %cst_55 : f32 to vector<16x128xf32>
    %63 = arith.maximumf %60, %62 : vector<16x128xf32>
    %64 = arith.addf %63, %61 : vector<16x128xf32>
    %cst_56 = arith.constant 0.000000e+00 : f32
    %65 = vector.broadcast %cst_56 : f32 to vector<16x128xf32>
    %66 = arith.maximumf %64, %65 : vector<16x128xf32>
    %c0_57 = arith.constant 0 : index
    %c0_58 = arith.constant 0 : index
    %67 = vector.load %arg7[%c0_57, %c0_58] : memref<1x256xf32, #tpu.memory_space<vmem>>, vector<1x256xf32>
    %cst_59 = arith.constant 0.000000e+00 : f32
    %68 = vector.broadcast %cst_59 : f32 to vector<16x8xf32>
    %c1_60 = arith.constant 1 : index
    %c0_61 = arith.constant 0 : index
    %69 = vector.load %arg9[%c1_60, %c0_61] : memref<18x144xf32, #tpu.memory_space<vmem>>, vector<16x8xf32>
    tpu.vector_store %arg9[%c1_60, %c0_61], %68 {strides = array<i32>} : memref<18x144xf32, #tpu.memory_space<vmem>>, vector<16x8xf32>,
    %c1_62 = arith.constant 1 : index
    %c136_63 = arith.constant 136 : index
    %70 = vector.load %arg9[%c1_62, %c136_63] : memref<18x144xf32, #tpu.memory_space<vmem>>, vector<16x8xf32>
    tpu.vector_store %arg9[%c1_62, %c136_63], %68 {strides = array<i32>} : memref<18x144xf32, #tpu.memory_space<vmem>>, vector<16x8xf32>,
    %c1_64 = arith.constant 1 : index
    %c8_65 = arith.constant 8 : index
    %71 = vector.load %arg9[%c1_64, %c8_65] : memref<18x144xf32, #tpu.memory_space<vmem>>, vector<16x128xf32>
    tpu.vector_store %arg9[%c1_64, %c8_65], %66 {strides = array<i32>} : memref<18x144xf32, #tpu.memory_space<vmem>>, vector<16x128xf32>,
    %c0_66 = arith.constant 0 : index
    %c0_67 = arith.constant 0 : index
    %72 = vector.load %arg9[%c0_66, %c0_67] : memref<18x144xf32, #tpu.memory_space<vmem>>, vector<16x144xf32>
    %73 = arith.truncf %72 : vector<16x144xf32> to vector<16x144xbf16>
    %c0_68 = arith.constant 0 : index
    %c0_69 = arith.constant 0 : index
    %c0_70 = arith.constant 0 : index
    %74 = vector.load %arg6[%c0_68, %c0_69, %c0_70] : memref<3x144x256xbf16, #tpu.memory_space<vmem>>, vector<1x144x256xbf16>
    %75 = vector.shape_cast %74 : vector<1x144x256xbf16> to vector<144x256xbf16>
    %cst_71 = arith.constant dense<0.000000e+00> : vector<16x256xf32>
    %76 = tpu.matmul %73, %75, %cst_71 {dimension_numbers = #tpu.dot_dimension_numbers<[1], [0], [0], [1], [0, 0, 1, 1], [], []>} : vector<16x144xbf16>, vector<144x256xbf16>, vector<16x256xf32> -> vector<16x256xf32>
    %c1_72 = arith.constant 1 : index
    %c0_73 = arith.constant 0 : index
    %77 = vector.load %arg9[%c1_72, %c0_73] : memref<18x144xf32, #tpu.memory_space<vmem>>, vector<16x144xf32>
    %78 = arith.truncf %77 : vector<16x144xf32> to vector<16x144xbf16>
    %c1_74 = arith.constant 1 : index
    %c0_75 = arith.constant 0 : index
    %c0_76 = arith.constant 0 : index
    %79 = vector.load %arg6[%c1_74, %c0_75, %c0_76] : memref<3x144x256xbf16, #tpu.memory_space<vmem>>, vector<1x144x256xbf16>
    %80 = vector.shape_cast %79 : vector<1x144x256xbf16> to vector<144x256xbf16>
    %cst_77 = arith.constant dense<0.000000e+00> : vector<16x256xf32>
    %81 = tpu.matmul %78, %80, %cst_77 {dimension_numbers = #tpu.dot_dimension_numbers<[1], [0], [0], [1], [0, 0, 1, 1], [], []>} : vector<16x144xbf16>, vector<144x256xbf16>, vector<16x256xf32> -> vector<16x256xf32>
    %82 = arith.addf %76, %81 : vector<16x256xf32>
    %c2_78 = arith.constant 2 : index
    %c0_79 = arith.constant 0 : index
    %83 = vector.load %arg9[%c2_78, %c0_79] : memref<18x144xf32, #tpu.memory_space<vmem>>, vector<16x144xf32>
    %84 = arith.truncf %83 : vector<16x144xf32> to vector<16x144xbf16>
    %c2_80 = arith.constant 2 : index
    %c0_81 = arith.constant 0 : index
    %c0_82 = arith.constant 0 : index
    %85 = vector.load %arg6[%c2_80, %c0_81, %c0_82] : memref<3x144x256xbf16, #tpu.memory_space<vmem>>, vector<1x144x256xbf16>
    %86 = vector.shape_cast %85 : vector<1x144x256xbf16> to vector<144x256xbf16>
    %cst_83 = arith.constant dense<0.000000e+00> : vector<16x256xf32>
    %87 = tpu.matmul %84, %86, %cst_83 {dimension_numbers = #tpu.dot_dimension_numbers<[1], [0], [0], [1], [0, 0, 1, 1], [], []>} : vector<16x144xbf16>, vector<144x256xbf16>, vector<16x256xf32> -> vector<16x256xf32>
    %88 = arith.addf %82, %87 : vector<16x256xf32>
    %89 = vector.broadcast %67 : vector<1x256xf32> to vector<16x256xf32>
    %90 = arith.addf %88, %89 : vector<16x256xf32>
    %91 = vector.extract_strided_slice %90 {offsets = [0, 0], sizes = [16, 128], strides = [1, 1]} : vector<16x256xf32> to vector<16x128xf32>
    %92 = vector.extract_strided_slice %90 {offsets = [0, 128], sizes = [16, 128], strides = [1, 1]} : vector<16x256xf32> to vector<16x128xf32>
    %cst_84 = arith.constant 0.000000e+00 : f32
    %93 = vector.broadcast %cst_84 : f32 to vector<16x128xf32>
    %94 = arith.maximumf %91, %93 : vector<16x128xf32>
    %95 = arith.addf %94, %92 : vector<16x128xf32>
    %cst_85 = arith.constant 0.000000e+00 : f32
    %96 = vector.broadcast %cst_85 : f32 to vector<16x128xf32>
    %97 = arith.maximumf %95, %96 : vector<16x128xf32>
    %c0_86 = arith.constant 0 : index
    %c0_87 = arith.constant 0 : index
    %c0_88 = arith.constant 0 : index
    %98 = vector.load %arg8[%c0_86, %c0_87, %c0_88] : memref<1x16x128xf32, #tpu.memory_space<vmem>>, vector<1x16x128xf32>
    %99 = vector.shape_cast %98 : vector<1x16x128xf32> to vector<16x128xf32>
    %100 = vector.shape_cast %97 : vector<16x128xf32> to vector<1x16x128xf32>
    tpu.vector_store %arg8[%c0_86, %c0_87, %c0_88], %100 {strides = array<i32>} : memref<1x16x128xf32, #tpu.memory_space<vmem>>, vector<1x16x128xf32>,
    return
  }
  func.func @transform_0(%arg0: i32) -> (i32, i32, i32) {
    %c0_i32 = arith.constant 0 : i32
    %c0_i32_0 = arith.constant 0 : i32
    %c0_i32_1 = arith.constant 0 : i32
    return %arg0, %c0_i32, %c0_i32_0 : i32, i32, i32
  }
  func.func @transform_1(%arg0: i32) -> (i32, i32, i32) {
    %c0_i32 = arith.constant 0 : i32
    %c0_i32_0 = arith.constant 0 : i32
    %c0_i32_1 = arith.constant 0 : i32
    %c0_i32_2 = arith.constant 0 : i32
    return %c0_i32, %c0_i32_0, %c0_i32_1 : i32, i32, i32
  }
  func.func @transform_2(%arg0: i32) -> (i32, i32) {
    %c0_i32 = arith.constant 0 : i32
    %c0_i32_0 = arith.constant 0 : i32
    %c0_i32_1 = arith.constant 0 : i32
    return %c0_i32, %c0_i32_0 : i32, i32
  }
  func.func @transform_3(%arg0: i32) -> (i32, i32, i32) {
    %c0_i32 = arith.constant 0 : i32
    %c0_i32_0 = arith.constant 0 : i32
    %c0_i32_1 = arith.constant 0 : i32
    %c0_i32_2 = arith.constant 0 : i32
    return %c0_i32, %c0_i32_0, %c0_i32_1 : i32, i32, i32
  }
  func.func @transform_4(%arg0: i32) -> (i32, i32) {
    %c0_i32 = arith.constant 0 : i32
    %c0_i32_0 = arith.constant 0 : i32
    %c0_i32_1 = arith.constant 0 : i32
    return %c0_i32, %c0_i32_0 : i32, i32
  }
  func.func @transform_5(%arg0: i32) -> (i32, i32, i32) {
    %c0_i32 = arith.constant 0 : i32
    %c0_i32_0 = arith.constant 0 : i32
    %c0_i32_1 = arith.constant 0 : i32
    %c0_i32_2 = arith.constant 0 : i32
    return %c0_i32, %c0_i32_0, %c0_i32_1 : i32, i32, i32
  }
  func.func @transform_6(%arg0: i32) -> (i32, i32) {
    %c0_i32 = arith.constant 0 : i32
    %c0_i32_0 = arith.constant 0 : i32
    %c0_i32_1 = arith.constant 0 : i32
    return %c0_i32, %c0_i32_0 : i32, i32
  }
  func.func @transform_7(%arg0: i32) -> (i32, i32, i32) {
    %c0_i32 = arith.constant 0 : i32
    %c0_i32_0 = arith.constant 0 : i32
    %c0_i32_1 = arith.constant 0 : i32
    return %arg0, %c0_i32, %c0_i32_0 : i32, i32, i32
  }
}

</mosaic_0001>

<bundles_post_ra>
// kernel: respath_forward_pallas.1
= control target key start
LH: loop header
LB: loop body
LE: loop exit
PB: predicated region body
PF: predicated region fallthrough
CT: control target
= control target key end

     0   :  { %12 = vsyncpa [#allocation4], 0  ;;  %s3185_s0 = inlined_call_operand.vmem [shape: f32[2,16,64], index: 0, kind: input, shape index: {}]   ;;  %s3186_s1 = inlined_call_operand.vmem [shape: bf16[3,72,256], index: 1, kind: input, shape index: {}]   ;;  %s3187_s2 = inlined_call_operand.vmem [shape: f32[1,256], index: 2, kind: input, shape index: {}]   ;;  %s3188_s3 = inlined_call_operand.hbm [shape: bf16[3,144,256], index: 3, kind: input, shape index: {}]   ;;  %s3189_s4 = inlined_call_operand.vmem [shape: f32[1,256], index: 4, kind: input, shape index: {}]   ;;  %s3190_s5 = inlined_call_operand.hbm [shape: bf16[3,144,256], index: 5, kind: input, shape index: {}]   ;;  %s3191_s6 = inlined_call_operand.vmem [shape: f32[1,256], index: 6, kind: input, shape index: {}]   ;;  %s3192_s7 = inlined_call_operand.vmem [shape: f32[2,16,128], index: 7, kind: output, shape index: {}]  }
   0x1   :  { %13 = vsyncpa [#allocation6], 0  ;;  %s2858_s24 = smov 0  }
   0x2 LB: > { %s219_s27 = sshll.u32 %s3188_s3, 4  ;;  %s1988_s28 = sadd.s32 4294967295, %s2809_s24   ;;  %s2809_s24 = sphi %s2858_s24, %s19_s24   ;;  %s220_s27 = int_to_ptr.hbm [resolvable:$true] %s219_s27 }
   0x3   : > { %p1990_p0 = scmp.ge.s32.totalorder %s2809_s24, 1  ;;  %p202_p1 = scmp.lt.s32.totalorder %s2809_s24, 3 }
   0x4   : > { %p2716_p2 = scmp.eq.s32.totalorder %s1988_s28, 0  ;;  %s2811_s30 = smov [#allocation3]  }
   0x5   : > { %p2869_p3 = pnand %p1990_p0, %p202_p1  ;;  %s221_s8 = sshll.u32 %s2811_s30, 4  ;;  %s222_s8 = int_to_ptr.vmem [resolvable:$true] %s221_s8 }
   0x6   : > { %s236_s11 = sshll.u32 %s3190_s5, 4  ;;  %s2812_s12 = smov [#allocation5]   ;;  %s237_s11 = int_to_ptr.hbm [resolvable:$true] %s236_s11 }
   0x7   : > { %p2709_p4 = pneg %p2869_p3  ;;  %s238_s13 = sshll.u32 %s2812_s12, 4  ;;  %s239_s13 = int_to_ptr.vmem [resolvable:$true] %s238_s13 }
   0x8   : > { %s2813_s14 = smov 128   ;;  %s2814_s15 = smov 8  }
   0x9   : > { %p2710_p5 = pnand %p2716_p2, %p2709_p4  ;;  %265 = sbr.rel (%p2869_p3) target bundleno = 973 (0x3cd), region = 48 }
   0xb   : > { %2712 = dma.hbm_to_vmem [thread:$0]  (!%p2710_p5), %s220_s27, 6912, %s222_s8, [#allocation4], %s2813_s14, %s2813_s14, %s2814_s15  }
   0xc   : > { %2715 = dma.hbm_to_vmem [thread:$0]  (!%p2710_p5), %s237_s11, 6912, %s239_s13, [#allocation6], %s2813_s14, %s2813_s14, %s2814_s15  }
   0xe   : > { %2800 = dma.done.wait (%p2716_p2), [#allocation4], 6912  }
   0xf   : > { %2802 = vsyncadd (%p2716_p2), [#allocation4], 4294960384 }
  0x10   : > { %2804 = dma.done.wait (%p2716_p2), [#allocation6], 6912  }
  0x11   : > { %2806 = vsyncadd (%p2716_p2), [#allocation6], 4294960384  ;;  %p303_p6 = scmp.lt.s32.totalorder %s1988_s28, 1  ;;  %vm326_vm0 = vcmask 31745   ;;  %vm332_vm1 = vcmask 589345   ;;  %v2815_v0 = vmov 0.0   ;;  %v314_v13 = vlaneseq }
  0x12   : > { %327 = vst.msk [vmem:[#allocation2] sm:$0xfe] %vm326_vm0, %v2815_v0  ;;  %v370_v3 = vld [vmem:[%s3186_s1 + $0x40] sm:$0xff]  ;;  %vm447_vm2 = vcmask 1043456   ;;  %s2816_s22 = smov 4   ;;  %vm340_vm3 = vcmask 1040384  }
  0x13   : > { %s3197_s28 = smov (!%p303_p6, %s1988_s28), 1  ;;  %333 = vst.msk [vmem:[#allocation2] sm:$0xfe] %vm332_vm1, %v2815_v0  ;;  %v507_v6 = vunpack.c.l.b16 %v370_v3  ;;  %v508_v7 = vunpack.c.h.b16 %v370_v3  ;;  %v2009_v14 = vld [vmem:[%s3186_s1 + $0x88] sm:$0xff]  ;;  %vm2904_vm4 = vcmp.lt.s32.totalorder %v314_v13, 144  ;;  %vm330_vm5 = vcmask 24576  }
  0x14   : > { %s2567_s16 = sshll.u32 %s3197_s28, 4  ;;  %v2070_v16 = vld [vmem:[%s3186_s1 + $0x30] sm:$0xf]  ;;  %v2576_v17 = vld [vmem:[%s3186_s1 + $0x34] sm:$0xf0]  ;;  %v423_v19 = vunpack.c.l.b16 %v2009_v14  ;;  %v424_v20 = vunpack.c.h.b16 %v2009_v14  ;;  %vm336_vm6 = vcmask 582176  }
  0x15   : > { %s307_s19 = scalar_lea.vmem %s3185_s0, %s2567_s16  ;;  %v517_v8 = vpack.c.b16 %v507_v6, %v507_v6  ;;  %v518_v9 = vpack.c.b16 %v508_v7, %v508_v7  ;;  %v2575_v18 = vld [vmem:[%s3186_s1 + $0x34] sm:$0xf]  ;;  %v2071_v21 = vor.u32 %v2576_v17, %v2070_v16  ;;  %v2072_v22 = vld [vmem:[%s3186_s1 + $0x38] sm:$0xf0]  ;;  %v2062_v23 = vld [vmem:[%s3186_s1 + $0x20] sm:$0xf]  ;;  %s312_s11 = scalar_lea.vmem %s3192_s7, %s2567_s16 }
  0x16   : > { %v323_v1 = vld [vmem:[%s307_s19] sm:$0xff]  ;;  %v324_v2 = vld [vmem:[%s307_s19 + $0x8] sm:$0xff]  ;;  %v2075_v25 = vor.u32 %v2575_v18, %v2072_v22  ;;  %v433_v26 = vpack.c.b16 %v423_v19, %v423_v19  ;;  %v434_v27 = vpack.c.b16 %v424_v20, %v424_v20  ;;  %318 = vst.msk [vmem:[#allocation2] ss:$8 sm:$0x3] %vm2904_vm4, %v2815_v0  ;;  %vm328_vm7 = vcmask 31744  }
  0x17   : > { %v341_v4 = vrot.slane %v323_v1, 7  ;;  %v342_v5 = vrot.slane %v324_v2, 7  ;;  %v531_v10 = vsel %vm447_vm2, %v517_v8, 0  ;;  %v534_v11 = vsel %vm447_vm2, %v518_v9, 0  ;;  %v2574_v24 = vld [vmem:[%s3186_s1 + $0x24] sm:$0xf0] }
  0x18   : > { %539 = vmatpush.bf16.msra.mxu2 %v531_v10  ;;  %553 = vmatpush.bf16.msra.mxu3 %v534_v11  ;;  %v2573_v28 = vld [vmem:[%s3186_s1 + $0x24] sm:$0xf]  ;;  %v2064_v29 = vld [vmem:[%s3186_s1 + $0x28] sm:$0xf0]  ;;  %v2063_v30 = vor.u32 %v2574_v24, %v2062_v23  ;;  %v449_v32 = vsel %vm447_vm2, %v433_v26, 0  ;;  %v452_v33 = vsel %vm447_vm2, %v434_v27, 0 }
  0x19   : > { %344 = vrot.lane.b32.xlu0 %v341_v4, %s2816_s22  ;;  %348 = vrot.lane.b32.xlu1 %v342_v5, %s2816_s22  ;;  %v343_v12 = vsel %vm340_vm3, %v341_v4, %v342_v5  ;;  %v2067_v31 = vor.u32 %v2573_v28, %v2064_v29  ;;  %331 = vst.msk [vmem:[#allocation2 + $0x20] sm:$0x1] %vm330_vm5, %v2815_v0  ;;  %vm334_vm8 = vcmask 589344   ;;  %v2036_v34 = vld [vmem:[%s3186_s1 + $0x78] sm:$0xf]  ;;  %v2086_v1 = vld [vmem:[%s3186_s1 + $0xd0] sm:$0xff] }
  0x1a   : > { %457 = vmatpush.bf16.msra.mxu0 %v449_v32  ;;  %471 = vmatpush.bf16.msra.mxu1 %v452_v33  ;;  %337 = vst.msk [vmem:[#allocation2 + $0x20] sm:$0x1] %vm336_vm6, %v2815_v0  ;;  %v2584_v35 = vld [vmem:[%s3186_s1 + $0x7c] sm:$0xf0]  ;;  %v2583_v37 = vld [vmem:[%s3186_s1 + $0x7c] sm:$0xf]  ;;  %v609_v2 = vunpack.c.l.b16 %v2086_v1  ;;  %v610_v3 = vunpack.c.h.b16 %v2086_v1 }
  0x1b   : > { %329 = vst.msk [vmem:[#allocation2 + $0x10] sm:$0xff] %vm328_vm7, %v2815_v0  ;;  %v2037_v36 = vor.u32 %v2584_v35, %v2036_v34  ;;  %v2038_v38 = vld [vmem:[%s3186_s1 + $0x80] sm:$0xf0]  ;;  %v2054_v40 = vld [vmem:[%s3186_s1 + $0x10] sm:$0xf]  ;;  %vm353_vm9 = vcmask 556065  }
  0x1c   : > { %540 = vmatpush.bf16.msra.mxu2 %v2071_v21  ;;  %554 = vmatpush.bf16.msra.mxu3 %v2075_v25  ;;  %335 = vst.msk [vmem:[#allocation2 + $0x10] sm:$0xff] %vm334_vm8, %v2815_v0  ;;  %v2041_v39 = vor.u32 %v2583_v37, %v2038_v38  ;;  %v2572_v41 = vld [vmem:[%s3186_s1 + $0x14] sm:$0xf0]  ;;  %v2571_v42 = vld [vmem:[%s3186_s1 + $0x14] sm:$0xf]  ;;  %v619_v9 = vpack.c.b16 %v609_v2, %v609_v2  ;;  %vm357_vm10 = vcmask 548896  }
  0x1d   : > { %v2055_v43 = vor.u32 %v2572_v41, %v2054_v40  ;;  %v2056_v44 = vld [vmem:[%s3186_s1 + $0x18] sm:$0xf0]  ;;  %v2028_v45 = vld [vmem:[%s3186_s1 + $0x68] sm:$0xf]  ;;  %v2582_v46 = vld [vmem:[%s3186_s1 + $0x6c] sm:$0xf0]  ;;  %v620_v10 = vpack.c.b16 %v610_v3, %v610_v3 }
  0x1e   : > { %458 = vmatpush.bf16.msra.mxu0 %v2037_v36  ;;  %472 = vmatpush.bf16.msra.mxu1 %v2041_v39  ;;  %v2059_v47 = vor.u32 %v2571_v42, %v2056_v44  ;;  %v2029_v48 = vor.u32 %v2582_v46, %v2028_v45  ;;  %v2581_v49 = vld [vmem:[%s3186_s1 + $0x6c] sm:$0xf]  ;;  %v2030_v50 = vld [vmem:[%s3186_s1 + $0x70] sm:$0xf0]  ;;  %v2046_v51 = vld [vmem:[%s3186_s1] sm:$0xf] }
  0x1f   : > { %v2033_v52 = vor.u32 %v2581_v49, %v2030_v50  ;;  %v2570_v53 = vld [vmem:[%s3186_s1 + $0x4] sm:$0xf0]  ;;  %v2569_v54 = vld [vmem:[%s3186_s1 + $0x4] sm:$0xf]  ;;  %v2048_v55 = vld [vmem:[%s3186_s1 + $0x8] sm:$0xf0] }
  0x20   : > { %541 = vmatpush.bf16.msra.mxu2 %v2063_v30  ;;  %555 = vmatpush.bf16.msra.mxu3 %v2067_v31  ;;  %v2047_v56 = vor.u32 %v2570_v53, %v2046_v51  ;;  %v2051_v57 = vor.u32 %v2569_v54, %v2048_v55  ;;  %v2020_v58 = vld [vmem:[%s3186_s1 + $0x58] sm:$0xf]  ;;  %v2580_v59 = vld [vmem:[%s3186_s1 + $0x5c] sm:$0xf0]  ;;  %v2579_v60 = vld [vmem:[%s3186_s1 + $0x5c] sm:$0xf] }
  0x21   : > { %346 = vrot.lane.b32.xlu0 %v343_v12, %s2816_s22  ;;  %v2021_v61 = vor.u32 %v2580_v59, %v2020_v58  ;;  %v2022_v62 = vld [vmem:[%s3186_s1 + $0x60] sm:$0xf0]  ;;  %321 = vst.msk [vmem:[#allocation2 + $0x21] ss:$8 sm:$0x3] %vm2904_vm4, %v2815_v0  ;;  %v633_v12 = vsel %vm447_vm2, %v619_v9, 0 }
  0x22   : > { %459 = vmatpush.bf16.msra.mxu0 %v2029_v48  ;;  %473 = vmatpush.bf16.msra.mxu1 %v2033_v52  ;;  %v2025_v63 = vor.u32 %v2579_v60, %v2022_v62  ;;  %v2012_v4 = vld [vmem:[%s3186_s1 + $0x48] sm:$0xf]  ;;  %v2578_v5 = vld [vmem:[%s3186_s1 + $0x4c] sm:$0xf0]  ;;  %v2577_v6 = vld [vmem:[%s3186_s1 + $0x4c] sm:$0xf] }
  0x23   : > { %v2013_v7 = vor.u32 %v2578_v5, %v2012_v4  ;;  %v2014_v8 = vld [vmem:[%s3186_s1 + $0x50] sm:$0xf0]  ;;  %v636_v13 = vsel %vm447_vm2, %v620_v10, 0  ;;  %v2113_v14 = vld [vmem:[%s3186_s1 + $0xc0] sm:$0xf]  ;;  %vm355_vm11 = vcmask 556064  }
  0x24   : > { %542 = vmatpush.bf16.msra.mxu2 %v2055_v43  ;;  %556 = vmatpush.bf16.msra.mxu3 %v2059_v47  ;;  %v2017_v11 = vor.u32 %v2577_v6, %v2014_v8  ;;  %v2592_v15 = vld [vmem:[%s3186_s1 + $0xc4] sm:$0xf0]  ;;  %v2591_v16 = vld [vmem:[%s3186_s1 + $0xc4] sm:$0xf]  ;;  %v2115_v18 = vld [vmem:[%s3186_s1 + $0xc8] sm:$0xf0] }
  0x25   : > { %v2114_v17 = vor.u32 %v2592_v15, %v2113_v14  ;;  %v2118_v19 = vor.u32 %v2591_v16, %v2115_v18  ;;  %v2105_v20 = vld [vmem:[%s3186_s1 + $0xb0] sm:$0xf]  ;;  %v2590_v21 = vld [vmem:[%s3186_s1 + $0xb4] sm:$0xf0]  ;;  %v2589_v22 = vld [vmem:[%s3186_s1 + $0xb4] sm:$0xf] }
  0x26   : > { %460 = vmatpush.bf16.msra.mxu0 %v2021_v61  ;;  %474 = vmatpush.bf16.msra.mxu1 %v2025_v63  ;;  %v2106_v23 = vor.u32 %v2590_v21, %v2105_v20  ;;  %v2107_v24 = vld [vmem:[%s3186_s1 + $0xb8] sm:$0xf0]  ;;  %v2097_v26 = vld [vmem:[%s3186_s1 + $0xa0] sm:$0xf]  ;;  %v2588_v27 = vld [vmem:[%s3186_s1 + $0xa4] sm:$0xf0] }
  0x27   : > { %v2110_v25 = vor.u32 %v2589_v22, %v2107_v24  ;;  %v2587_v28 = vld [vmem:[%s3186_s1 + $0xa4] sm:$0xf]  ;;  %v2099_v29 = vld [vmem:[%s3186_s1 + $0xa8] sm:$0xf0]  ;;  %v2098_v30 = vor.u32 %v2588_v27, %v2097_v26  ;;  %v2089_v34 = vld [vmem:[%s3186_s1 + $0x90] sm:$0xf] }
  0x28   : > { %543 = vmatpush.bf16.msra.mxu2 %v2047_v56  ;;  %557 = vmatpush.bf16.msra.mxu3 %v2051_v57  ;;  %v2102_v33 = vor.u32 %v2587_v28, %v2099_v29  ;;  %v2586_v35 = vld [vmem:[%s3186_s1 + $0x94] sm:$0xf0]  ;;  %v2585_v36 = vld [vmem:[%s3186_s1 + $0x94] sm:$0xf]  ;;  %v2091_v37 = vld [vmem:[%s3186_s1 + $0x98] sm:$0xf0] }
  0x29   : > { %v2090_v38 = vor.u32 %v2586_v35, %v2089_v34  ;;  %v2094_v39 = vor.u32 %v2585_v36, %v2091_v37  ;;  %vm443_vm12 = vcmask 588800   ;;  %vm385_vm13 = vsmask.f32 7424  ;;  %v325_v5 = vld [vmem:[%s3187_s2] sm:$0x3]  ;;  %s2817_s26 = smov 8  }
  0x2a   : > { %461 = vmatpush.bf16.msra.mxu0 %v2013_v7  ;;  %475 = vmatpush.bf16.msra.mxu1 %v2017_v11  ;;  %vm580_vm14 = vcmask 1046528   ;;  %v671_v6 = vperm.slane %v325_v5, 0  ;;  %v2253_v7 = vld [vmem:[#allocation3 + $0x70] sm:$0xf]  ;;  %v2608_v8 = vld [vmem:[#allocation3 + $0x74] sm:$0xf0] }
  0x2b   : > { %v2607_v9 = vld [vmem:[#allocation3 + $0x74] sm:$0xf]  ;;  %v2245_v14 = vld [vmem:[#allocation3 + $0x60] sm:$0xf]  ;;  %v2606_v15 = vld [vmem:[#allocation3 + $0x64] sm:$0xf0] }
  0x2c   : > { %v2247_v20 = vld [vmem:[#allocation3 + $0x68] sm:$0xf0]  ;;  %vm688_vm15 = vcmask 64512   ;;  %vm694_vm0 = vcmask 130112   ;;  %v2246_v24 = vor.u32 %v2606_v15, %v2245_v14  ;;  %vm690_vm1 = vcmask 57344  }
  0x2d   : > { %695 = vst.msk [vmem:[#allocation2 + $0x18] sm:$0xff] %vm694_vm0, %v2815_v0  ;;  %vm696_vm2 = vcmask 122944   ;;  %v2213_v14 = vld [vmem:[#allocation3 + $0x20] sm:$0xf]  ;;  %v2598_v15 = vld [vmem:[#allocation3 + $0x24] sm:$0xf0] }
  0x2e   : > { %641 = vmatpush.bf16.msrb.mxu0 %v633_v12  ;;  %655 = vmatpush.bf16.msrb.mxu1 %v636_v13  ;;  %v2254_v12 = vor.u32 %v2608_v8, %v2253_v7  ;;  %v2255_v13 = vld [vmem:[#allocation3 + $0x78] sm:$0xf0]  ;;  %697 = vst.msk [vmem:[#allocation2 + $0x28] sm:$0x1] %vm696_vm2, %v2815_v0  ;;  %v2599_v7 = vld [vmem:[#allocation3 + $0x34] sm:$0xf] }
  0x2f   : > { %v2258_v18 = vor.u32 %v2607_v9, %v2255_v13  ;;  %v2223_v9 = vld [vmem:[#allocation3 + $0x38] sm:$0xf0]  ;;  %vm686_vm4 = vcmask 64513   ;;  %vm692_vm5 = vcmask 130113   ;;  %vm715_vm6 = vcmask 1047616  }
  0x30   : > { %693 = vst.msk [vmem:[#allocation2 + $0x8] sm:$0xfe] %vm692_vm5, %v2815_v0  ;;  %vm718_vm7 = vcmask 1040448   ;;  %vm712_vm8 = vcmask 1047617  }
  0x32   : > { %642 = vmatpush.bf16.msrb.mxu0 %v2114_v17  ;;  %656 = vmatpush.bf16.msrb.mxu1 %v2118_v19  ;;  %v2605_v19 = vld [vmem:[#allocation3 + $0x64] sm:$0xf] }
  0x36   : > { %643 = vmatpush.bf16.msrb.mxu0 %v2106_v23  ;;  %657 = vmatpush.bf16.msrb.mxu1 %v2110_v25  ;;  %v672_v23 = vperm.slane %v325_v5, 1  ;;  %v2250_v25 = vor.u32 %v2605_v19, %v2247_v20  ;;  %v2221_v5 = vld [vmem:[#allocation3 + $0x30] sm:$0xf] }
  0x37   : > { %v2187_v20 = vld [vmem:[#allocation3 + $0x110] sm:$0xf] }
  0x3a   : > { %644 = vmatpush.bf16.msrb.mxu0 %v2098_v30  ;;  %658 = vmatpush.bf16.msrb.mxu1 %v2102_v33 }
  0x3e   : > { %645 = vmatpush.bf16.msrb.mxu0 %v2090_v38  ;;  %659 = vmatpush.bf16.msrb.mxu1 %v2094_v39 }
  0x8b   : > { %v345_v31 = vpop.permute.xlu0 %344  ;;  %v349_v32 = vpop.permute.xlu1 %348 }
  0x8c   : > { %354 = vst.msk [vmem:[#allocation2] sm:$0xfe] %vm353_vm9, %v345_v31  ;;  %vm887_vm9 = vcmask 130048  }
  0x8d   : > { %358 = vst.msk [vmem:[#allocation2 + $0x20] sm:$0x1] %vm357_vm10, %v349_v32 }
  0x93   : > { %v347_v40 = vpop.permute.xlu0 %346  ;;  %v359_v43 = vld [vmem:[#allocation2] sm:$0xff] }
  0x94   : > { %356 = vst.msk [vmem:[#allocation2 + $0x10] sm:$0xff] %vm355_vm11, %v347_v40  ;;  %v372_v41 = vld [vmem:[#allocation2 + $0x20] sm:$0x1]  ;;  %v371_v45 = vld [vmem:[#allocation2] sm:$0xfe] }
  0x95   : > { %v374_v42 = vpack.c.bf16 %v372_v41, %v372_v41  ;;  %v565_v55 = vld [vmem:[#allocation2 + $0x20] sm:$0x3]  ;;  %v564_v56 = vld [vmem:[#allocation2] sm:$0xfc] }
  0x96   : > { %v567_v58 = vpack.c.bf16 %v565_v55, %v565_v55  ;;  %v2171_v55 = vld [vmem:[#allocation3 + $0xf0] sm:$0xf]  ;;  %691 = vst.msk [vmem:[#allocation2 + $0x20] sm:$0x1] %vm690_vm1, %v2815_v0 }
  0x97   : > { %v394_v48 = vshll.u32 %v374_v42, 16  ;;  %687 = vst.msk [vmem:[#allocation2] sm:$0xfe] %vm686_vm4, %v2815_v0 }
  0x98   : > { %v582_v60 = vrot.slane %v567_v58, 1 }
  0x99   : > { %v396_v52 = vrot.slane %v394_v48, 1  ;;  %v2626_v48 = vld [vmem:[#allocation3 + $0x104] sm:$0xf0] }
  0x9b   : > { %v360_v44 = vld [vmem:[#allocation2 + $0x10] sm:$0xff] }
  0x9c   : > { %v361_v46 = vpack.c.bf16 %v360_v44, %v359_v43  ;;  %v373_v47 = vpack.c.bf16 %v360_v44, %v371_v45  ;;  %v566_v57 = vpack.c.bf16 %v360_v44, %v564_v56  ;;  %689 = vst.msk [vmem:[#allocation2 + $0x10] sm:$0xff] %vm688_vm15, %v2815_v0  ;;  %v2624_v56 = vld [vmem:[#allocation3 + $0xf4] sm:$0xf0] }
  0x9d   : > { %v2172_v58 = vor.u32 %v2624_v56, %v2171_v55  ;;  %v2619_v55 = vld [vmem:[#allocation3 + $0xd4] sm:$0xf] }
  0x9e   : > { %2076 = vmatmul.msk.bf16.vlgmr.msra.gmra.mxu2 %vm443_vm12, %v361_v46  ;;  %2077 = vmatmul.msk.bf16.vlgmr.msra.gmra.mxu3 %vm443_vm12, %v361_v46  ;;  %v389_v49 = vshll.u32 %v373_v47, 16  ;;  %v387_v50 = vshrl.u32 %v373_v47, 16  ;;  %v581_v59 = vrot.slane %v566_v57, 1  ;;  %v2179_v47 = vld [vmem:[#allocation3 + $0x100] sm:$0xf] }
  0xa0   : > { %v391_v51 = vrot.slane %v389_v49, 1  ;;  %v583_v61 = vsel %vm580_vm14, %v581_v59, %v582_v60  ;;  %v2180_v49 = vor.u32 %v2626_v48, %v2179_v47  ;;  %v2229_v59 = vld [vmem:[#allocation3 + $0x40] sm:$0xf]  ;;  %v2602_v60 = vld [vmem:[#allocation3 + $0x44] sm:$0xf0] }
  0xa1   : > { %v2614_v47 = vld [vmem:[#allocation3 + $0xa4] sm:$0xf0] }
  0xa2   : > { %v392_v53 = vor.u32 %v391_v51, %v387_v50  ;;  %v2237_v50 = vld [vmem:[#allocation3 + $0x50] sm:$0xf]  ;;  %v2604_v51 = vld [vmem:[#allocation3 + $0x54] sm:$0xf0]  ;;  %891 = vmatpush.bf16.msrb.mxu2 %v2180_v49  ;;  %v2621_v49 = vld [vmem:[#allocation3 + $0xe4] sm:$0xf] }
  0xa4   : > { %v397_v54 = vsel %vm385_vm13, %v392_v53, %v396_v52  ;;  %v2603_v52 = vld [vmem:[#allocation3 + $0x54] sm:$0xf]  ;;  %v2238_v53 = vor.u32 %v2604_v51, %v2237_v50  ;;  %v2165_v50 = vld [vmem:[#allocation3 + $0xe8] sm:$0xf0] }
  0xa5   : > { %2042 = vmatmul.msk.bf16.vlgmr.msra.gmra.mxu0 %vm443_vm12, %v397_v54  ;;  %2043 = vmatmul.msk.bf16.vlgmr.msra.gmra.mxu1 %vm443_vm12, %v397_v54  ;;  %v2239_v54 = vld [vmem:[#allocation3 + $0x58] sm:$0xf0] }
  0xa6   : > { %1040 = vmatpush.bf16.msra.mxu1 %v2254_v12  ;;  %1068 = vmatpush.bf16.msra.mxu0 %v2258_v18  ;;  %v2242_v57 = vor.u32 %v2603_v52, %v2239_v54  ;;  %v2226_v12 = vor.u32 %v2599_v7, %v2223_v9  ;;  %v2215_v18 = vld [vmem:[#allocation3 + $0x28] sm:$0xf0]  ;;  %v2168_v52 = vor.u32 %v2621_v49, %v2165_v50  ;;  %v2612_v54 = vld [vmem:[#allocation3 + $0x94] sm:$0xf0]  ;;  %v2646_v7 = vld [vmem:[#allocation3 + $0x1a4] sm:$0xf0] }
  0xa7   : > { %892 = vmatpush.bf16.msrb.mxu2 %v2172_v58  ;;  %v2337_v9 = vld [vmem:[#allocation3 + $0x1a8] sm:$0xf0] }
  0xaa   : > { %1041 = vmatpush.bf16.msra.mxu1 %v2246_v24  ;;  %1069 = vmatpush.bf16.msra.mxu0 %v2250_v25  ;;  %v2618_v24 = vld [vmem:[#allocation3 + $0xc4] sm:$0xf0]  ;;  %v2625_v25 = vld [vmem:[#allocation3 + $0x104] sm:$0xf] }
  0xae   : > { %1042 = vmatpush.bf16.msra.mxu1 %v2238_v53  ;;  %1070 = vmatpush.bf16.msra.mxu0 %v2242_v57  ;;  %v2123_v53 = vld [vmem:[#allocation3 + $0x90] sm:$0xf]  ;;  %v2157_v57 = vld [vmem:[#allocation3 + $0xd8] sm:$0xf0] }
  0xaf   : > { %v2124_v56 = vor.u32 %v2612_v54, %v2123_v53  ;;  %v2160_v58 = vor.u32 %v2619_v55, %v2157_v57 }
  0xb5   : > { %2119 = vmatmul.msk.bf16.vlgmr.msrb.gmra.mxu0 %vm443_vm12, %v583_v61  ;;  %2120 = vmatmul.msk.bf16.vlgmr.msrb.gmra.mxu1 %vm443_vm12, %v583_v61  ;;  %v2601_v61 = vld [vmem:[#allocation3 + $0x44] sm:$0xf] }
 0x121   : > { %v545_v3 = vpop.f32.mrf.mxu2  ;;  %v559_v4 = vpop.f32.mrf.mxu3 }
 0x122   : > { %v463_v62 = vpop.f32.mrf.mxu0  ;;  %v477_v63 = vpop.f32.mrf.mxu1 }
 0x123   : > { %v546_v10 = vadd.f32 %v545_v3, %v463_v62  ;;  %v560_v11 = vadd.f32 %v559_v4, %v477_v63  ;;  %v2230_v62 = vor.u32 %v2602_v60, %v2229_v59  ;;  %v2231_v63 = vld [vmem:[#allocation3 + $0x48] sm:$0xf0]  ;;  %v2622_v3 = vld [vmem:[#allocation3 + $0xe4] sm:$0xf0]  ;;  %v2617_v60 = vld [vmem:[#allocation3 + $0xc4] sm:$0xf] }
 0x125   : > { %1043 = vmatpush.bf16.msra.mxu1 %v2230_v62 }
 0x129   : > { %v547_v27 = vpop.f32.mrf.mxu2  ;;  %v561_v28 = vpop.f32.mrf.mxu3 }
 0x12a   : > { %v465_v1 = vpop.f32.mrf.mxu0  ;;  %v479_v2 = vpop.f32.mrf.mxu1 }
 0x12b   : > { %v548_v31 = vadd.f32 %v547_v27, %v465_v1  ;;  %v562_v32 = vadd.f32 %v561_v28, %v479_v2  ;;  %v2234_v1 = vor.u32 %v2601_v61, %v2231_v63  ;;  %v2163_v2 = vld [vmem:[#allocation3 + $0xe0] sm:$0xf]  ;;  %v2181_v27 = vld [vmem:[#allocation3 + $0x108] sm:$0xf0]  ;;  %v2205_v28 = vld [vmem:[#allocation3 + $0x10] sm:$0xf] }
 0x12c   : > { %v2164_v4 = vor.u32 %v2622_v3, %v2163_v2  ;;  %v2149_v61 = vld [vmem:[#allocation3 + $0xc8] sm:$0xf0]  ;;  %v2261_v63 = vld [vmem:[#allocation3 + $0x80] sm:$0xf]  ;;  %v2615_v3 = vld [vmem:[#allocation3 + $0xb4] sm:$0xf] }
 0x12d   : > { %1071 = vmatpush.bf16.msra.mxu0 %v2234_v1  ;;  %v2152_v62 = vor.u32 %v2617_v60, %v2149_v61  ;;  %v2610_v1 = vld [vmem:[#allocation3 + $0x84] sm:$0xf0]  ;;  %v2643_v61 = vld [vmem:[#allocation3 + $0x194] sm:$0xf] }
 0x12e   : > { %893 = vmatpush.bf16.msrb.mxu2 %v2164_v4  ;;  %v2262_v2 = vor.u32 %v2610_v1, %v2261_v63  ;;  %v2141_v4 = vld [vmem:[#allocation3 + $0xb8] sm:$0xf0]  ;;  %v2327_v63 = vld [vmem:[#allocation3 + $0x190] sm:$0xf]  ;;  %v2644_v1 = vld [vmem:[#allocation3 + $0x194] sm:$0xf0] }
 0x131   : > { %1072 = vmatpush.bf16.msra.mxu0 %v2226_v12  ;;  %v2613_v12 = vld [vmem:[#allocation3 + $0xa4] sm:$0xf] }
 0x132   : > { %v647_v16 = vpop.f32.mrf.mxu0  ;;  %v661_v17 = vpop.f32.mrf.mxu1 }
 0x133   : > { %v666_v21 = vadd.f32 %v647_v16, %v546_v10  ;;  %v667_v22 = vadd.f32 %v661_v17, %v560_v11  ;;  %v2155_v10 = vld [vmem:[#allocation3 + $0xd0] sm:$0xf]  ;;  %v2620_v11 = vld [vmem:[#allocation3 + $0xd4] sm:$0xf0]  ;;  %v2597_v16 = vld [vmem:[#allocation3 + $0x24] sm:$0xf]  ;;  %v2214_v17 = vor.u32 %v2598_v15, %v2213_v14 }
 0x134   : > { %v2156_v13 = vor.u32 %v2620_v11, %v2155_v10  ;;  %v2218_v19 = vor.u32 %v2597_v16, %v2215_v18  ;;  %v2125_v18 = vld [vmem:[#allocation3 + $0x98] sm:$0xf0] }
 0x135   : > { %v675_v26 = vadd.f32 %v671_v6, %v666_v21  ;;  %v676_v30 = vadd.f32 %v672_v23, %v667_v22  ;;  %v2628_v21 = vld [vmem:[#allocation3 + $0x114] sm:$0xf0] }
 0x136   : > { %894 = vmatpush.bf16.msrb.mxu2 %v2156_v13  ;;  %v2188_v22 = vor.u32 %v2628_v21, %v2187_v20  ;;  %1073 = vmatpush.bf16.msra.mxu0 %v2218_v19  ;;  %v2133_v13 = vld [vmem:[#allocation3 + $0xa8] sm:$0xf0] }
 0x137   : > { %v679_v29 = vmax.f32 %v675_v26, 0.0  ;;  %v2136_v15 = vor.u32 %v2613_v12, %v2133_v13  ;;  %v2313_v12 = vld [vmem:[#allocation3 + $0x178] sm:$0xf0]  ;;  %v2311_v13 = vld [vmem:[#allocation3 + $0x170] sm:$0xf] }
 0x138   : > { %912 = vmatpush.bf16.msrb.mxu3 %v2188_v22 }
 0x139   : > { %v681_v33 = vadd.f32 %v679_v29, %v676_v30  ;;  %v2596_v29 = vld [vmem:[#allocation3 + $0x14] sm:$0xf0]  ;;  %v2184_v30 = vor.u32 %v2625_v25, %v2181_v27 }
 0x13a   : > { %v649_v34 = vpop.f32.mrf.mxu0  ;;  %v663_v35 = vpop.f32.mrf.mxu1 }
 0x13b   : > { %v668_v36 = vadd.f32 %v649_v34, %v548_v31  ;;  %v669_v37 = vadd.f32 %v663_v35, %v562_v32  ;;  %v683_v38 = vmax.f32 %v681_v33, 0.0  ;;  %v2206_v31 = vor.u32 %v2596_v29, %v2205_v28  ;;  %v2595_v32 = vld [vmem:[#allocation3 + $0x14] sm:$0xf]  ;;  %v2207_v33 = vld [vmem:[#allocation3 + $0x18] sm:$0xf0] }
 0x13c   : > { %v2139_v34 = vld [vmem:[#allocation3 + $0xb0] sm:$0xf]  ;;  %v2210_v35 = vor.u32 %v2595_v32, %v2207_v33  ;;  %919 = vmatpush.bf16.msra.mxu3 %v2184_v30 }
 0x13d   : > { %v677_v39 = vadd.f32 %v671_v6, %v668_v36  ;;  %v700_v40 = vrot.slane %v683_v38, 7  ;;  %v678_v42 = vadd.f32 %v672_v23, %v669_v37  ;;  %v2600_v6 = vld [vmem:[#allocation3 + $0x34] sm:$0xf0]  ;;  %v2147_v23 = vld [vmem:[#allocation3 + $0xc0] sm:$0xf] }
 0x13e   : > { %v2222_v8 = vor.u32 %v2600_v6, %v2221_v5  ;;  %v2148_v26 = vor.u32 %v2618_v24, %v2147_v23  ;;  %v2616_v36 = vld [vmem:[#allocation3 + $0xb4] sm:$0xf0]  ;;  %v2623_v37 = vld [vmem:[#allocation3 + $0xf4] sm:$0xf]  ;;  %v2173_v38 = vld [vmem:[#allocation3 + $0xf8] sm:$0xf0]  ;;  %1074 = vmatpush.bf16.msra.mxu0 %v2210_v35  ;;  %v2144_v6 = vor.u32 %v2615_v3, %v2141_v4  ;;  %v2328_v4 = vor.u32 %v2644_v1, %v2327_v63 }
 0x13f   : > { %v680_v41 = vmax.f32 %v677_v39, 0.0  ;;  %703 = vrot.lane.b32.xlu1 %v700_v40, %s2817_s26  ;;  %v2140_v39 = vor.u32 %v2616_v36, %v2139_v34  ;;  %v2335_v5 = vld [vmem:[#allocation3 + $0x1a0] sm:$0xf] }
 0x140   : > { %1044 = vmatpush.bf16.msra.mxu1 %v2222_v8  ;;  %895 = vmatpush.bf16.msrb.mxu2 %v2148_v26  ;;  %v2645_v8 = vld [vmem:[#allocation3 + $0x1a4] sm:$0xf]  ;;  %v2336_v10 = vor.u32 %v2646_v7, %v2335_v5  ;;  %v2319_v7 = vld [vmem:[#allocation3 + $0x180] sm:$0xf] }
 0x141   : > { %v682_v43 = vadd.f32 %v680_v41, %v678_v42  ;;  %v2197_v41 = vld [vmem:[#allocation3] sm:$0xf]  ;;  %v2594_v42 = vld [vmem:[#allocation3 + $0x4] sm:$0xf0]  ;;  %v2340_v11 = vor.u32 %v2645_v8, %v2337_v9  ;;  %v2641_v5 = vld [vmem:[#allocation3 + $0x184] sm:$0xf] }
 0x142   : > { %v2642_v8 = vld [vmem:[#allocation3 + $0x184] sm:$0xf0] }
 0x143   : > { %v684_v44 = vmax.f32 %v682_v43, 0.0  ;;  %v2593_v43 = vld [vmem:[#allocation3 + $0x4] sm:$0xf] }
 0x144   : > { %1045 = vmatpush.bf16.msra.mxu1 %v2214_v17  ;;  %896 = vmatpush.bf16.msrb.mxu2 %v2140_v39  ;;  %v2611_v17 = vld [vmem:[#allocation3 + $0x94] sm:$0xf] }
 0x145   : > { %v701_v45 = vrot.slane %v684_v44, 7  ;;  %v2198_v44 = vor.u32 %v2594_v42, %v2197_v41  ;;  %v2128_v20 = vor.u32 %v2611_v17, %v2125_v18  ;;  %v2263_v41 = vld [vmem:[#allocation3 + $0x88] sm:$0xf0]  ;;  %v2637_v18 = vld [vmem:[#allocation3 + $0x164] sm:$0xf] }
 0x147   : > { %v702_v46 = vsel %vm340_vm3, %v700_v40, %v701_v45  ;;  %v2176_v40 = vor.u32 %v2623_v37, %v2173_v38  ;;  %v2627_v37 = vld [vmem:[#allocation3 + $0x114] sm:$0xf] }
 0x148   : > { %705 = vrot.lane.b32.xlu2 %v702_v46, %s2817_s26  ;;  %1046 = vmatpush.bf16.msra.mxu1 %v2206_v31  ;;  %v2131_v46 = vld [vmem:[#allocation3 + $0xa0] sm:$0xf] }
 0x149   : > { %v2132_v51 = vor.u32 %v2614_v47, %v2131_v46  ;;  %920 = vmatpush.bf16.msra.mxu3 %v2176_v40  ;;  %v2609_v40 = vld [vmem:[#allocation3 + $0x84] sm:$0xf] }
 0x14b   : > { %897 = vmatpush.bf16.msrb.mxu2 %v2132_v51  ;;  %v2266_v51 = vor.u32 %v2609_v40, %v2263_v41 }
 0x14c   : > { %1047 = vmatpush.bf16.msra.mxu1 %v2198_v44  ;;  %v2189_v44 = vld [vmem:[#allocation3 + $0x118] sm:$0xf0] }
 0x14d   : > { %921 = vmatpush.bf16.msra.mxu3 %v2168_v52  ;;  %v2192_v54 = vor.u32 %v2627_v37, %v2189_v44  ;;  %v2281_v37 = vld [vmem:[#allocation3 + $0x138] sm:$0xf0]  ;;  %v2271_v44 = vld [vmem:[#allocation3 + $0x120] sm:$0xf] }
 0x14f   : > { %898 = vmatpush.bf16.msrb.mxu2 %v2124_v56 }
 0x150   : > { %707 = vrot.lane.b32.xlu2 %v701_v45, %s2817_s26  ;;  %v2199_v45 = vld [vmem:[#allocation3 + $0x8] sm:$0xf0]  ;;  %1248 = vmatpush.bf16.msrb.mxu1 %v2336_v10  ;;  %v2320_v10 = vor.u32 %v2642_v8, %v2319_v7 }
 0x151   : > { %v2202_v48 = vor.u32 %v2593_v43, %v2199_v45  ;;  %922 = vmatpush.bf16.msra.mxu3 %v2160_v58 }
 0x153   : > { %1075 = vmatpush.bf16.msra.mxu0 %v2202_v48  ;;  %1061 = vmatpush.bf16.msra.mxu2 %v2262_v2 }
 0x155   : > { %923 = vmatpush.bf16.msra.mxu3 %v2152_v62  ;;  %v2329_v62 = vld [vmem:[#allocation3 + $0x198] sm:$0xf0] }
 0x156   : > { %v2332_v2 = vor.u32 %v2643_v61, %v2329_v62 }
 0x157   : > { %1276 = vmatpush.bf16.msrb.mxu0 %v2340_v11  ;;  %v2639_v11 = vld [vmem:[#allocation3 + $0x174] sm:$0xf] }
 0x159   : > { %924 = vmatpush.bf16.msra.mxu3 %v2144_v6  ;;  %v2321_v6 = vld [vmem:[#allocation3 + $0x188] sm:$0xf0] }
 0x15a   : > { %v2324_v9 = vor.u32 %v2641_v5, %v2321_v6 }
 0x15d   : > { %925 = vmatpush.bf16.msra.mxu3 %v2136_v15  ;;  %v2316_v15 = vor.u32 %v2639_v11, %v2313_v12 }
 0x161   : > { %926 = vmatpush.bf16.msra.mxu3 %v2128_v20  ;;  %v2303_v20 = vld [vmem:[#allocation3 + $0x160] sm:$0xf] }
 0x1a2   : > { %v706_v59 = vpop.permute.xlu2 %705 }
 0x1a3   : > { %716 = vst.msk [vmem:[#allocation2 + $0x10] sm:$0xff] %vm715_vm6, %v706_v59 }
 0x1a4   : > { %717 = vst.msk [vmem:[#allocation2 + $0x18] sm:$0xff] %vm688_vm15, %v706_v59 }
 0x1aa   : > { %v708_v14 = vpop.permute.xlu2 %707  ;;  %v3099_v16 = vld [vmem:[#allocation2 + $0x10] sm:$0xff] }
 0x1ab   : > { %719 = vst.msk [vmem:[#allocation2 + $0x20] sm:$0x1] %vm718_vm7, %v708_v14  ;;  %v3104_v19 = vld [vmem:[#allocation2 + $0x18] sm:$0xff] }
 0x1ac   : > { %720 = vst.msk [vmem:[#allocation2 + $0x28] sm:$0x1] %vm690_vm1, %v708_v14  ;;  %v2640_v14 = vld [vmem:[#allocation3 + $0x174] sm:$0xf0] }
 0x1ad   : > { %1304 = vst.msk [vmem:[#allocation2 + $0x10] sm:$0xff] %vm688_vm15, %v2815_v0  ;;  %v2312_v17 = vor.u32 %v2640_v14, %v2311_v13 }
 0x1ae   : > { %1307 = vst.msk [vmem:[#allocation2 + $0x18] sm:$0xff] %vm694_vm0, %v2815_v0 }
 0x1b1   : > { %v704_v21 = vpop.permute.xlu1 %703 }
 0x1b2   : > { %713 = vst.msk [vmem:[#allocation2] sm:$0xfe] %vm712_vm8, %v704_v21  ;;  %v747_v24 = vld [vmem:[#allocation2 + $0x20] sm:$0x1] }
 0x1b3   : > { %714 = vst.msk [vmem:[#allocation2 + $0x8] sm:$0xfe] %vm686_vm4, %v704_v21  ;;  %v748_v22 = vld [vmem:[#allocation2 + $0x28] sm:$0x1]  ;;  %v751_v25 = vpack.c.bf16 %v747_v24, %v747_v24  ;;  %v3119_v48 = vld [vmem:[#allocation2 + $0x20] sm:$0x3] }
 0x1b4   : > { %v1099_v23 = vld [vmem:[#allocation2 + $0x28] sm:$0x3]  ;;  %v752_v28 = vpack.c.bf16 %v748_v22, %v748_v22  ;;  %1305 = vst.msk [vmem:[#allocation2 + $0x20] sm:$0x1] %vm690_vm1, %v2815_v0  ;;  %v2638_v21 = vld [vmem:[#allocation3 + $0x164] sm:$0xf0] }
 0x1b5   : > { %1308 = vst.msk [vmem:[#allocation2 + $0x28] sm:$0x1] %vm696_vm2, %v2815_v0  ;;  %v780_v36 = vshll.u32 %v751_v25, 16  ;;  %v1103_v58 = vpack.c.bf16 %v1099_v23, %v1099_v23  ;;  %v2304_v23 = vor.u32 %v2638_v21, %v2303_v20  ;;  %v2635_v24 = vld [vmem:[#allocation3 + $0x154] sm:$0xf] }
 0x1b6   : > { %v792_v39 = vshll.u32 %v752_v28, 16  ;;  %v2297_v25 = vld [vmem:[#allocation3 + $0x158] sm:$0xf0] }
 0x1b7   : > { %v782_v50 = vrot.slane %v780_v36, 1  ;;  %v1131_v60 = vrot.slane %v1103_v58, 1  ;;  %v2300_v28 = vor.u32 %v2635_v24, %v2297_v25  ;;  %v2631_v36 = vld [vmem:[#allocation3 + $0x134] sm:$0xf] }
 0x1b8   : > { %v794_v53 = vrot.slane %v792_v39, 1  ;;  %v2632_v39 = vld [vmem:[#allocation3 + $0x134] sm:$0xf0]  ;;  %v2284_v40 = vor.u32 %v2631_v36, %v2281_v37 }
 0x1b9   : > { %v721_v26 = vld [vmem:[#allocation2] sm:$0xff] }
 0x1ba   : > { %v745_v27 = vld [vmem:[#allocation2] sm:$0xfe]  ;;  %v725_v29 = vpack.c.bf16 %v3099_v16, %v721_v26  ;;  %v746_v31 = vld [vmem:[#allocation2 + $0x8] sm:$0xfe] }
 0x1bb   : > { %v749_v30 = vpack.c.bf16 %v3099_v16, %v745_v27  ;;  %v1097_v32 = vld [vmem:[#allocation2 + $0x8] sm:$0xfc]  ;;  %v750_v34 = vpack.c.bf16 %v3104_v19, %v746_v31  ;;  %v3117_v45 = vld [vmem:[#allocation2] sm:$0xfc]  ;;  %v2289_v31 = vld [vmem:[#allocation3 + $0x148] sm:$0xf0] }
 0x1bc   : > { %v722_v33 = vld [vmem:[#allocation2 + $0x8] sm:$0xff]  ;;  %1048 = vmatmul.bf16.vlgmr.msra.gmra.mxu1 %v725_v29  ;;  %1076 = vmatmul.bf16.vlgmr.msra.gmra.mxu0 %v725_v29  ;;  %1303 = vst.msk [vmem:[#allocation2] sm:$0xfe] %vm686_vm4, %v2815_v0  ;;  %v1101_v57 = vpack.c.bf16 %v3104_v19, %v1097_v32  ;;  %v2295_v26 = vld [vmem:[#allocation3 + $0x150] sm:$0xf] }
 0x1bd   : > { %1306 = vst.msk [vmem:[#allocation2 + $0x8] sm:$0xfe] %vm692_vm5, %v2815_v0  ;;  %v775_v35 = vshll.u32 %v749_v30, 16  ;;  %v787_v38 = vshll.u32 %v750_v34, 16  ;;  %v773_v42 = vshrl.u32 %v749_v30, 16  ;;  %v785_v46 = vshrl.u32 %v750_v34, 16 }
 0x1be   : > { %v1130_v59 = vrot.slane %v1101_v57, 1  ;;  %v726_v3 = vpack.c.bf16 %v3104_v19, %v722_v33  ;;  %v2305_v19 = vld [vmem:[#allocation3 + $0x168] sm:$0xf0]  ;;  %v2636_v27 = vld [vmem:[#allocation3 + $0x154] sm:$0xf0] }
 0x1bf   : > { %v777_v43 = vrot.slane %v775_v35, 1  ;;  %v789_v47 = vrot.slane %v787_v38, 1  ;;  %v2308_v22 = vor.u32 %v2637_v18, %v2305_v19  ;;  %v2296_v29 = vor.u32 %v2636_v27, %v2295_v26  ;;  %v2633_v30 = vld [vmem:[#allocation3 + $0x144] sm:$0xf]  ;;  %v2287_v32 = vld [vmem:[#allocation3 + $0x140] sm:$0xf] }
 0x1c0   : > { %v1132_v0 = vsel %vm580_vm14, %v1130_v59, %v1131_v60  ;;  %v2634_v33 = vld [vmem:[#allocation3 + $0x144] sm:$0xf0]  ;;  %v2292_v34 = vor.u32 %v2633_v30, %v2289_v31  ;;  %v2279_v38 = vld [vmem:[#allocation3 + $0x130] sm:$0xf] }
 0x1c1   : > { %v778_v49 = vor.u32 %v777_v43, %v773_v42  ;;  %v790_v52 = vor.u32 %v789_v47, %v785_v46  ;;  %v2288_v35 = vor.u32 %v2634_v33, %v2287_v32  ;;  %v2280_v41 = vor.u32 %v2632_v39, %v2279_v38  ;;  %v2629_v42 = vld [vmem:[#allocation3 + $0x124] sm:$0xf]  ;;  %v2273_v43 = vld [vmem:[#allocation3 + $0x128] sm:$0xf0]  ;;  %v2630_v46 = vld [vmem:[#allocation3 + $0x124] sm:$0xf0] }
 0x1c2   : > { %v1100_v47 = vpack.c.bf16 %v3099_v16, %v3117_v45 }
 0x1c3   : > { %v783_v55 = vsel %vm385_vm13, %v778_v49, %v782_v50  ;;  %v795_v56 = vsel %vm385_vm13, %v790_v52, %v794_v53  ;;  %v2276_v49 = vor.u32 %v2629_v42, %v2273_v43  ;;  %v1102_v50 = vpack.c.bf16 %v3119_v48, %v3119_v48 }
 0x1c4   : > { %899 = vmatmul.bf16.vlgmr.msrb.gmra.mxu2 %v783_v55  ;;  %2193 = vmatmul.msk.bf16.vlgmr.msrb.gmra.mxu3 %vm887_vm9, %v795_v56  ;;  %v1127_v52 = vrot.slane %v1100_v47, 1 }
 0x1c5   : > { %1089 = vmatpush.bf16.msrb.mxu2 %v2266_v51  ;;  %940 = vmatpush.bf16.msrb.mxu3 %v2192_v54  ;;  %v2272_v51 = vor.u32 %v2630_v46, %v2271_v44  ;;  %v1128_v53 = vrot.slane %v1102_v50, 1 }
 0x1c7   : > { %v1129_v54 = vsel %vm580_vm14, %v1127_v52, %v1128_v53  ;;  %v2680_v52 = vld [vmem:[#allocation5 + $0x104] sm:$0xf0]  ;;  %v2679_v53 = vld [vmem:[#allocation5 + $0x104] sm:$0xf] }
 0x1cc   : > { %2341 = vmatmul.msk.bf16.vlgmr.msrb.gmra.mxu1 %vm887_vm9, %v1132_v0  ;;  %2342 = vmatmul.msk.bf16.vlgmr.msrb.gmra.mxu0 %vm887_vm9, %v1132_v0 }
 0x1d4   : > { %2267 = vmatmul.msk.bf16.vlgmr.msra.gmra.mxu2 %vm887_vm9, %v726_v3  ;;  %927 = vmatmul.bf16.vlgmr.msra.gmra.mxu3 %v783_v55 }
 0x1d5   : > { %1255 = vmatpush.bf16.msra.mxu2 %v2332_v2  ;;  %1227 = vmatpush.bf16.msra.mxu3 %v2328_v4 }
 0x1d9   : > { %1256 = vmatpush.bf16.msra.mxu2 %v2324_v9  ;;  %1228 = vmatpush.bf16.msra.mxu3 %v2320_v10  ;;  %v685_v10 = vld [vmem:[%s3189_s4] sm:$0x3] }
 0x1da   : > { %v1288_v19 = vperm.slane %v685_v10, 0 }
 0x1dd   : > { %1257 = vmatpush.bf16.msra.mxu2 %v2316_v15  ;;  %1229 = vmatpush.bf16.msra.mxu3 %v2312_v17 }
 0x1e1   : > { %1258 = vmatpush.bf16.msra.mxu2 %v2308_v22  ;;  %1230 = vmatpush.bf16.msra.mxu3 %v2304_v23  ;;  %v1289_v23 = vperm.slane %v685_v10, 1  ;;  %v2681_v10 = vld [vmem:[#allocation5 + $0x114] sm:$0xf] }
 0x1e4   : > { %2268 = vmatmul.msk.bf16.vlgmr.msrb.gmra.mxu2 %vm887_vm9, %v726_v3  ;;  %2194 = vmatmul.msk.bf16.vlgmr.msrb.gmra.mxu3 %vm887_vm9, %v795_v56 }
 0x1e5   : > { %1259 = vmatpush.bf16.msra.mxu2 %v2300_v28  ;;  %1231 = vmatpush.bf16.msra.mxu3 %v2296_v29 }
 0x1e9   : > { %1260 = vmatpush.bf16.msra.mxu2 %v2292_v34  ;;  %1232 = vmatpush.bf16.msra.mxu3 %v2288_v35 }
 0x1ed   : > { %1261 = vmatpush.bf16.msra.mxu2 %v2284_v40  ;;  %1233 = vmatpush.bf16.msra.mxu3 %v2280_v41 }
 0x1f1   : > { %1262 = vmatpush.bf16.msra.mxu2 %v2276_v49  ;;  %1234 = vmatpush.bf16.msra.mxu3 %v2272_v51  ;;  %v2401_v51 = vld [vmem:[#allocation5 + $0x100] sm:$0xf] }
 0x1f4   : > { %1263 = vmatmul.bf16.vlgmr.msra.gmra.mxu2 %v1129_v54  ;;  %1235 = vmatmul.bf16.vlgmr.msra.gmra.mxu3 %v1129_v54  ;;  %v2402_v54 = vor.u32 %v2680_v52, %v2401_v51  ;;  %v2461_v51 = vld [vmem:[#allocation5 + $0x58] sm:$0xf0] }
 0x1f6   : > { %1498 = vmatpush.bf16.msra.mxu1 %v2402_v54  ;;  %v2345_v54 = vld [vmem:[#allocation5 + $0x90] sm:$0xf] }
 0x239   : > { %v1077_v0 = vpop.f32.mrf.mxu0  ;;  %v1049_v48 = vpop.f32.mrf.mxu1 }
 0x241   : > { %v1079_v63 = vpop.f32.mrf.mxu0  ;;  %v1051_v1 = vpop.f32.mrf.mxu1 }
 0x247   : > { %v900_v55 = vpop.f32.mrf.mxu2  ;;  %v914_v56 = vpop.f32.mrf.mxu3 }
 0x248   : > { %v915_v5 = vadd.f32 %v914_v56, %v900_v55  ;;  %v2403_v55 = vld [vmem:[#allocation5 + $0x108] sm:$0xf0]  ;;  %v2393_v56 = vld [vmem:[#allocation5 + $0xf0] sm:$0xf] }
 0x249   : > { %v1278_v6 = vpop.f32.mrf.mxu0  ;;  %v1250_v8 = vpop.f32.mrf.mxu1 }
 0x24a   : > { %v1050_v9 = vadd.f32 %v1049_v48, %v915_v5  ;;  %v2676_v48 = vld [vmem:[#allocation5 + $0xe4] sm:$0xf0]  ;;  %v2379_v5 = vld [vmem:[#allocation5 + $0xd8] sm:$0xf0] }
 0x24f   : > { %v902_v57 = vpop.f32.mrf.mxu2  ;;  %v916_v58 = vpop.f32.mrf.mxu3 }
 0x250   : > { %v917_v20 = vadd.f32 %v916_v58, %v902_v57  ;;  %v2678_v57 = vld [vmem:[#allocation5 + $0xf4] sm:$0xf0]  ;;  %v2406_v58 = vor.u32 %v2679_v53, %v2403_v55 }
 0x251   : > { %v1280_v26 = vpop.f32.mrf.mxu0  ;;  %v1252_v31 = vpop.f32.mrf.mxu1  ;;  %v2666_v55 = vld [vmem:[#allocation5 + $0x94] sm:$0xf0] }
 0x252   : > { %v1052_v27 = vadd.f32 %v1051_v1, %v917_v20  ;;  %1526 = vmatpush.bf16.msra.mxu0 %v2406_v58  ;;  %v2377_v1 = vld [vmem:[#allocation5 + $0xd0] sm:$0xf]  ;;  %v2451_v58 = vld [vmem:[#allocation5 + $0x40] sm:$0xf] }
 0x253   : > { %v2475_v20 = vld [vmem:[#allocation5 + $0x70] sm:$0xf] }
 0x257   : > { %v1063_v16 = vpop.f32.mrf.mxu2  ;;  %v928_v45 = vpop.f32.mrf.mxu3 }
 0x258   : > { %v1064_v12 = vadd.f32 %v1063_v16, %v1050_v9  ;;  %v2677_v16 = vld [vmem:[#allocation5 + $0xf4] sm:$0xf]  ;;  %v2682_v9 = vld [vmem:[#allocation5 + $0x114] sm:$0xf0] }
 0x25f   : > { %v1065_v59 = vpop.f32.mrf.mxu2  ;;  %v930_v60 = vpop.f32.mrf.mxu3 }
 0x260   : > { %v1066_v34 = vadd.f32 %v1065_v59, %v1052_v27  ;;  %v2394_v59 = vor.u32 %v2678_v57, %v2393_v56  ;;  %v2361_v27 = vld [vmem:[#allocation5 + $0xb0] sm:$0xf]  ;;  %v2665_v56 = vld [vmem:[#allocation5 + $0x94] sm:$0xf]  ;;  %v2347_v57 = vld [vmem:[#allocation5 + $0x98] sm:$0xf0] }
 0x262   : > { %1499 = vmatpush.bf16.msra.mxu1 %v2394_v59  ;;  %v2655_v59 = vld [vmem:[#allocation5 + $0x44] sm:$0xf] }
 0x267   : > { %v1091_v61 = vpop.f32.mrf.mxu2  ;;  %v942_v62 = vpop.f32.mrf.mxu3 }
 0x268   : > { %v943_v4 = vadd.f32 %v942_v62, %v928_v45  ;;  %v2395_v45 = vld [vmem:[#allocation5 + $0xf8] sm:$0xf0] }
 0x26a   : > { %v1078_v7 = vadd.f32 %v1077_v0, %v943_v4  ;;  %v2385_v0 = vld [vmem:[#allocation5 + $0xe0] sm:$0xf]  ;;  %v2673_v4 = vld [vmem:[#allocation5 + $0xd4] sm:$0xf] }
 0x26b   : > { %v2386_v62 = vor.u32 %v2676_v48, %v2385_v0  ;;  %v2350_v0 = vor.u32 %v2665_v56, %v2347_v57 }
 0x26c   : > { %v1092_v15 = vadd.f32 %v1091_v61, %v1078_v7  ;;  %v2675_v61 = vld [vmem:[#allocation5 + $0xe4] sm:$0xf]  ;;  %v2382_v7 = vor.u32 %v2673_v4, %v2379_v5  ;;  %v2443_v5 = vld [vmem:[#allocation5 + $0x30] sm:$0xf] }
 0x26d   : > { %1500 = vmatpush.bf16.msra.mxu1 %v2386_v62  ;;  %v2483_v62 = vld [vmem:[#allocation5 + $0x80] sm:$0xf] }
 0x26f   : > { %v1093_v2 = vpop.f32.mrf.mxu2  ;;  %v944_v3 = vpop.f32.mrf.mxu3 }
 0x270   : > { %v945_v17 = vadd.f32 %v944_v3, %v930_v60  ;;  %v2398_v60 = vor.u32 %v2677_v16, %v2395_v45  ;;  %v2656_v16 = vld [vmem:[#allocation5 + $0x44] sm:$0xf0]  ;;  %v2346_v45 = vor.u32 %v2666_v55, %v2345_v54  ;;  %v2557_v54 = vld [vmem:[#allocation5 + $0x1a0] sm:$0xf] }
 0x271   : > { %v2452_v48 = vor.u32 %v2656_v16, %v2451_v58  ;;  %v2700_v55 = vld [vmem:[#allocation5 + $0x1a4] sm:$0xf0]  ;;  %v2699_v58 = vld [vmem:[#allocation5 + $0x1a4] sm:$0xf]  ;;  %v2559_v16 = vld [vmem:[#allocation5 + $0x1a8] sm:$0xf0] }
 0x272   : > { %v1080_v24 = vadd.f32 %v1079_v63, %v945_v17  ;;  %1527 = vmatpush.bf16.msra.mxu0 %v2398_v60  ;;  %v2387_v63 = vld [vmem:[#allocation5 + $0xe8] sm:$0xf0] }
 0x273   : > { %v2390_v3 = vor.u32 %v2675_v61, %v2387_v63  ;;  %v2453_v60 = vld [vmem:[#allocation5 + $0x48] sm:$0xf0]  ;;  %v2664_v63 = vld [vmem:[#allocation5 + $0x84] sm:$0xf0] }
 0x274   : > { %v1094_v35 = vadd.f32 %v1093_v2, %v1080_v24  ;;  %v2674_v2 = vld [vmem:[#allocation5 + $0xd4] sm:$0xf0]  ;;  %v2477_v24 = vld [vmem:[#allocation5 + $0x78] sm:$0xf0]  ;;  %v2456_v61 = vor.u32 %v2655_v59, %v2453_v60 }
 0x276   : > { %1528 = vmatpush.bf16.msra.mxu0 %v2390_v3  ;;  %v2485_v3 = vld [vmem:[#allocation5 + $0x88] sm:$0xf0] }
 0x277   : > { %v1264_v11 = vpop.f32.mrf.mxu2  ;;  %v1236_v13 = vpop.f32.mrf.mxu3 }
 0x278   : > { %v1279_v14 = vadd.f32 %v1278_v6, %v1264_v11  ;;  %v1251_v18 = vadd.f32 %v1250_v8, %v1236_v13  ;;  %v2378_v6 = vor.u32 %v2674_v2, %v2377_v1  ;;  %v2409_v8 = vld [vmem:[#allocation5 + $0x110] sm:$0xf]  ;;  %v2369_v13 = vld [vmem:[#allocation5 + $0xc0] sm:$0xf]  ;;  %v2484_v1 = vor.u32 %v2664_v63, %v2483_v62  ;;  %v2663_v2 = vld [vmem:[#allocation5 + $0x84] sm:$0xf] }
 0x279   : > { %v2410_v11 = vor.u32 %v2682_v9, %v2409_v8  ;;  %v2488_v4 = vor.u32 %v2663_v2, %v2485_v3  ;;  %v2653_v8 = vld [vmem:[#allocation5 + $0x34] sm:$0xf]  ;;  %v2445_v9 = vld [vmem:[#allocation5 + $0x38] sm:$0xf0]  ;;  %v2541_v62 = vld [vmem:[#allocation5 + $0x180] sm:$0xf] }
 0x27a   : > { %v1283_v21 = vadd.f32 %v1251_v18, %v1064_v12  ;;  %v1284_v22 = vadd.f32 %v1279_v14, %v1092_v15  ;;  %1501 = vmatpush.bf16.msra.mxu1 %v2378_v6  ;;  %1529 = vmatpush.bf16.msra.mxu0 %v2382_v7  ;;  %v2411_v12 = vld [vmem:[#allocation5 + $0x118] sm:$0xf0]  ;;  %v2672_v14 = vld [vmem:[#allocation5 + $0xc4] sm:$0xf0]  ;;  %v2671_v18 = vld [vmem:[#allocation5 + $0xc4] sm:$0xf] }
 0x27b   : > { %v2414_v15 = vor.u32 %v2681_v10, %v2411_v12  ;;  %v2370_v17 = vor.u32 %v2672_v14, %v2369_v13  ;;  %1519 = vmatpush.bf16.msrb.mxu3 %v2410_v11  ;;  %v2654_v6 = vld [vmem:[#allocation5 + $0x34] sm:$0xf0]  ;;  %v2448_v11 = vor.u32 %v2653_v8, %v2445_v9  ;;  %v2435_v12 = vld [vmem:[#allocation5 + $0x20] sm:$0xf]  ;;  %v2652_v13 = vld [vmem:[#allocation5 + $0x24] sm:$0xf0] }
 0x27c   : > { %v1292_v25 = vadd.f32 %v1288_v19, %v1283_v21  ;;  %v1293_v29 = vadd.f32 %v1289_v23, %v1284_v22  ;;  %v2662_v22 = vld [vmem:[#allocation5 + $0x74] sm:$0xf0]  ;;  %v2444_v7 = vor.u32 %v2654_v6, %v2443_v5  ;;  %v2436_v14 = vor.u32 %v2652_v13, %v2435_v12  ;;  %v2695_v2 = vld [vmem:[#allocation5 + $0x184] sm:$0xf]  ;;  %v2543_v3 = vld [vmem:[#allocation5 + $0x188] sm:$0xf0] }
 0x27d   : > { %1547 = vmatpush.bf16.msrb.mxu2 %v2414_v15  ;;  %v2651_v15 = vld [vmem:[#allocation5 + $0x24] sm:$0xf]  ;;  %v2562_v5 = vor.u32 %v2699_v58, %v2559_v16  ;;  %v2546_v8 = vor.u32 %v2695_v2, %v2543_v3  ;;  %v2533_v9 = vld [vmem:[#allocation5 + $0x170] sm:$0xf]  ;;  %v2535_v12 = vld [vmem:[#allocation5 + $0x178] sm:$0xf0] }
 0x27e   : > { %v1296_v28 = vmax.f32 %v1292_v25, 0.0  ;;  %1502 = vmatpush.bf16.msra.mxu1 %v2370_v17  ;;  %v2476_v25 = vor.u32 %v2662_v22, %v2475_v20  ;;  %v2437_v17 = vld [vmem:[#allocation5 + $0x28] sm:$0xf0]  ;;  %v2650_v20 = vld [vmem:[#allocation5 + $0x14] sm:$0xf0] }
 0x27f   : > { %v1266_v30 = vpop.f32.mrf.mxu2  ;;  %v1238_v32 = vpop.f32.mrf.mxu3  ;;  %v2649_v22 = vld [vmem:[#allocation5 + $0x14] sm:$0xf] }
 0x280   : > { %v1281_v33 = vadd.f32 %v1280_v26, %v1266_v30  ;;  %v1253_v36 = vadd.f32 %v1252_v31, %v1238_v32  ;;  %v1298_v37 = vadd.f32 %v1296_v28, %v1293_v29  ;;  %v2670_v28 = vld [vmem:[#allocation5 + $0xb4] sm:$0xf0]  ;;  %v2669_v29 = vld [vmem:[#allocation5 + $0xb4] sm:$0xf]  ;;  %v2363_v32 = vld [vmem:[#allocation5 + $0xb8] sm:$0xf0]  ;;  %1647 = vmatpush.bf16.msra.mxu3 %v2476_v25 }
 0x281   : > { %v2362_v31 = vor.u32 %v2670_v28, %v2361_v27  ;;  %v2419_v25 = vld [vmem:[#allocation5] sm:$0xf]  ;;  %v2647_v27 = vld [vmem:[#allocation5 + $0x4] sm:$0xf]  ;;  %v2421_v28 = vld [vmem:[#allocation5 + $0x8] sm:$0xf0] }
 0x282   : > { %v1285_v38 = vadd.f32 %v1253_v36, %v1066_v34  ;;  %v1286_v39 = vadd.f32 %v1281_v33, %v1094_v35  ;;  %v1300_v40 = vmax.f32 %v1298_v37, 0.0  ;;  %v2467_v33 = vld [vmem:[#allocation5 + $0x60] sm:$0xf]  ;;  %v2660_v34 = vld [vmem:[#allocation5 + $0x64] sm:$0xf0]  ;;  %v2366_v35 = vor.u32 %v2669_v29, %v2363_v32 }
 0x283   : > { %v2468_v36 = vor.u32 %v2660_v34, %v2467_v33  ;;  %v2659_v37 = vld [vmem:[#allocation5 + $0x64] sm:$0xf]  ;;  %1503 = vmatpush.bf16.msra.mxu1 %v2362_v31  ;;  %v2424_v31 = vor.u32 %v2647_v27, %v2421_v28 }
 0x284   : > { %v1294_v41 = vadd.f32 %v1288_v19, %v1285_v38  ;;  %v1311_v42 = vrot.slane %v1300_v40, 7  ;;  %v1295_v44 = vadd.f32 %v1289_v23, %v1286_v39  ;;  %v2371_v19 = vld [vmem:[#allocation5 + $0xc8] sm:$0xf0]  ;;  %v2661_v23 = vld [vmem:[#allocation5 + $0x74] sm:$0xf] }
 0x285   : > { %v2374_v21 = vor.u32 %v2671_v18, %v2371_v19  ;;  %v2480_v26 = vor.u32 %v2661_v23, %v2477_v24  ;;  %v2469_v38 = vld [vmem:[#allocation5 + $0x68] sm:$0xf0]  ;;  %v2353_v40 = vld [vmem:[#allocation5 + $0xa0] sm:$0xf]  ;;  %1648 = vmatpush.bf16.msra.mxu3 %v2468_v36  ;;  %v2440_v18 = vor.u32 %v2651_v15, %v2437_v17  ;;  %v2427_v19 = vld [vmem:[#allocation5 + $0x10] sm:$0xf] }
 0x286   : > { %v1297_v43 = vmax.f32 %v1294_v41, 0.0  ;;  %1314 = vrot.lane.b32.xlu0 %v1311_v42, %s2817_s26  ;;  %v2472_v39 = vor.u32 %v2659_v37, %v2469_v38  ;;  %v2668_v41 = vld [vmem:[#allocation5 + $0xa4] sm:$0xf0]  ;;  %v2429_v23 = vld [vmem:[#allocation5 + $0x18] sm:$0xf0] }
 0x287   : > { %1530 = vmatpush.bf16.msra.mxu0 %v2374_v21  ;;  %1675 = vmatpush.bf16.msra.mxu2 %v2480_v26  ;;  %v2428_v21 = vor.u32 %v2650_v20, %v2427_v19  ;;  %v2432_v24 = vor.u32 %v2649_v22, %v2429_v23  ;;  %v2648_v26 = vld [vmem:[#allocation5 + $0x4] sm:$0xf0]  ;;  %v2525_v15 = vld [vmem:[#allocation5 + $0x160] sm:$0xf]  ;;  %v2527_v19 = vld [vmem:[#allocation5 + $0x168] sm:$0xf0] }
 0x288   : > { %v1299_v46 = vadd.f32 %v1297_v43, %v1295_v44  ;;  %v2667_v43 = vld [vmem:[#allocation5 + $0xa4] sm:$0xf]  ;;  %v2355_v44 = vld [vmem:[#allocation5 + $0xa8] sm:$0xf0]  ;;  %v2692_v17 = vld [vmem:[#allocation5 + $0x164] sm:$0xf0] }
 0x289   : > { %v2526_v20 = vor.u32 %v2692_v17, %v2525_v15  ;;  %v2517_v22 = vld [vmem:[#allocation5 + $0x150] sm:$0xf]  ;;  %v2690_v23 = vld [vmem:[#allocation5 + $0x154] sm:$0xf0] }
 0x28a   : > { %v1301_v47 = vmax.f32 %v1299_v46, 0.0  ;;  %v2459_v46 = vld [vmem:[#allocation5 + $0x50] sm:$0xf] }
 0x28b   : > { %1531 = vmatpush.bf16.msra.mxu0 %v2366_v35  ;;  %1676 = vmatpush.bf16.msra.mxu2 %v2472_v39 }
 0x28c   : > { %v1312_v49 = vrot.slane %v1301_v47, 7  ;;  %v2358_v47 = vor.u32 %v2667_v43, %v2355_v44  ;;  %v2549_v44 = vld [vmem:[#allocation5 + $0x190] sm:$0xf] }
 0x28e   : > { %1318 = vrot.lane.b32.xlu2 %v1312_v49, %s2817_s26  ;;  %v1313_v50 = vsel %vm340_vm3, %v1311_v42, %v1312_v49  ;;  %v2354_v42 = vor.u32 %v2668_v41, %v2353_v40  ;;  %v2658_v49 = vld [vmem:[#allocation5 + $0x54] sm:$0xf0] }
 0x28f   : > { %1316 = vrot.lane.b32.xlu1 %v1313_v50, %s2817_s26  ;;  %v2657_v50 = vld [vmem:[#allocation5 + $0x54] sm:$0xf]  ;;  %v2460_v52 = vor.u32 %v2658_v49, %v2459_v46  ;;  %1532 = vmatpush.bf16.msra.mxu0 %v2358_v47  ;;  %v2698_v46 = vld [vmem:[#allocation5 + $0x194] sm:$0xf0] }
 0x290   : > { %v2464_v53 = vor.u32 %v2657_v50, %v2461_v51  ;;  %1504 = vmatpush.bf16.msra.mxu1 %v2354_v42  ;;  %v2697_v50 = vld [vmem:[#allocation5 + $0x194] sm:$0xf]  ;;  %v2551_v51 = vld [vmem:[#allocation5 + $0x198] sm:$0xf0] }
 0x291   : > { %1649 = vmatpush.bf16.msra.mxu3 %v2460_v52 }
 0x292   : > { %1677 = vmatpush.bf16.msra.mxu2 %v2464_v53 }
 0x293   : > { %1533 = vmatpush.bf16.msra.mxu0 %v2350_v0 }
 0x294   : > { %1505 = vmatpush.bf16.msra.mxu1 %v2346_v45 }
 0x295   : > { %1650 = vmatpush.bf16.msra.mxu3 %v2452_v48  ;;  %v2550_v48 = vor.u32 %v2698_v46, %v2549_v44 }
 0x296   : > { %1678 = vmatpush.bf16.msra.mxu2 %v2456_v61  ;;  %v2554_v61 = vor.u32 %v2697_v50, %v2551_v51  ;;  %v2493_v50 = vld [vmem:[#allocation5 + $0x120] sm:$0xf] }
 0x297   : > { %1696 = vmatpush.bf16.msrb.mxu0 %v2488_v4  ;;  %v2558_v4 = vor.u32 %v2700_v55, %v2557_v54  ;;  %v2683_v54 = vld [vmem:[#allocation5 + $0x124] sm:$0xf]  ;;  %v2495_v55 = vld [vmem:[#allocation5 + $0x128] sm:$0xf0] }
 0x298   : > { %1668 = vmatpush.bf16.msrb.mxu1 %v2484_v1  ;;  %v2696_v1 = vld [vmem:[#allocation5 + $0x184] sm:$0xf0] }
 0x299   : > { %1651 = vmatpush.bf16.msra.mxu3 %v2444_v7  ;;  %v2542_v7 = vor.u32 %v2696_v1, %v2541_v62 }
 0x29a   : > { %1679 = vmatpush.bf16.msra.mxu2 %v2448_v11  ;;  %v2693_v11 = vld [vmem:[#allocation5 + $0x174] sm:$0xf] }
 0x29d   : > { %1652 = vmatpush.bf16.msra.mxu3 %v2436_v14  ;;  %v2538_v14 = vor.u32 %v2693_v11, %v2535_v12 }
 0x29e   : > { %1680 = vmatpush.bf16.msra.mxu2 %v2440_v18  ;;  %v2691_v18 = vld [vmem:[#allocation5 + $0x164] sm:$0xf] }
 0x2a1   : > { %1653 = vmatpush.bf16.msra.mxu3 %v2428_v21  ;;  %v2530_v21 = vor.u32 %v2691_v18, %v2527_v19 }
 0x2a2   : > { %1681 = vmatpush.bf16.msra.mxu2 %v2432_v24  ;;  %v2689_v24 = vld [vmem:[#allocation5 + $0x154] sm:$0xf] }
 0x2a6   : > { %1682 = vmatpush.bf16.msra.mxu2 %v2424_v31  ;;  %v2509_v31 = vld [vmem:[#allocation5 + $0x140] sm:$0xf] }
 0x2e8   : > { %v1319_v30 = vpop.permute.xlu2 %1318 }
 0x2e9   : > { %1327 = vst.msk [vmem:[#allocation2 + $0x20] sm:$0x1] %vm718_vm7, %v1319_v30 }
 0x2ea   : > { %1328 = vst.msk [vmem:[#allocation2 + $0x28] sm:$0x1] %vm690_vm1, %v1319_v30  ;;  %v2420_v30 = vor.u32 %v2648_v26, %v2419_v25  ;;  %v2519_v25 = vld [vmem:[#allocation5 + $0x158] sm:$0xf0] }
 0x2ec   : > { %1654 = vmatpush.bf16.msra.mxu3 %v2420_v30  ;;  %v2522_v30 = vor.u32 %v2689_v24, %v2519_v25 }
 0x2f0   : > { %v1355_v32 = vld [vmem:[#allocation2 + $0x20] sm:$0x1] }
 0x2f1   : > { %v1356_v33 = vld [vmem:[#allocation2 + $0x28] sm:$0x1]  ;;  %v1359_v34 = vpack.c.bf16 %v1355_v32, %v1355_v32  ;;  %v1705_v44 = vld [vmem:[#allocation2 + $0x20] sm:$0x3] }
 0x2f2   : > { %v1360_v37 = vpack.c.bf16 %v1356_v33, %v1356_v33  ;;  %v2688_v33 = vld [vmem:[#allocation5 + $0x144] sm:$0xf0]  ;;  %v1709_v58 = vpack.c.bf16 %v1705_v44, %v1705_v44 }
 0x2f3   : > { %v1388_v43 = vshll.u32 %v1359_v34, 16  ;;  %v2687_v34 = vld [vmem:[#allocation5 + $0x144] sm:$0xf]  ;;  %v1706_v46 = vld [vmem:[#allocation2 + $0x28] sm:$0x3] }
 0x2f4   : > { %v1400_v49 = vshll.u32 %v1360_v37, 16  ;;  %v2510_v37 = vor.u32 %v2688_v33, %v2509_v31 }
 0x2f5   : > { %v1390_v59 = vrot.slane %v1388_v43, 1  ;;  %v2503_v43 = vld [vmem:[#allocation5 + $0x138] sm:$0xf0] }
 0x2f6   : > { %v1402_v0 = vrot.slane %v1400_v49, 1 }
 0x2f8   : > { %v1315_v10 = vpop.permute.xlu0 %1314 }
 0x2f9   : > { %1323 = vst.msk [vmem:[#allocation2] sm:$0xfe] %vm712_vm8, %v1315_v10 }
 0x2fa   : > { %1324 = vst.msk [vmem:[#allocation2 + $0x8] sm:$0xfe] %vm686_vm4, %v1315_v10  ;;  %v2694_v10 = vld [vmem:[#allocation5 + $0x174] sm:$0xf0] }
 0x2fb   : > { %v2534_v13 = vor.u32 %v2694_v10, %v2533_v9 }
 0x300   : > { %v1353_v36 = vld [vmem:[#allocation2] sm:$0xfe] }
 0x301   : > { %v1317_v29 = vpop.permute.xlu1 %1316  ;;  %v1354_v40 = vld [vmem:[#allocation2 + $0x8] sm:$0xfe]  ;;  %v1329_v27 = vld [vmem:[#allocation2] sm:$0xff] }
 0x302   : > { %1325 = vst.msk [vmem:[#allocation2 + $0x10] sm:$0xff] %vm715_vm6, %v1317_v29  ;;  %v1330_v26 = vld [vmem:[#allocation2 + $0x8] sm:$0xff]  ;;  %v1703_v51 = vld [vmem:[#allocation2] sm:$0xfc] }
 0x303   : > { %1326 = vst.msk [vmem:[#allocation2 + $0x18] sm:$0xff] %vm688_vm15, %v1317_v29  ;;  %v2518_v29 = vor.u32 %v2690_v23, %v2517_v22 }
 0x309   : > { %v3154_v35 = vld [vmem:[#allocation2 + $0x10] sm:$0xff] }
 0x30a   : > { %v1357_v38 = vpack.c.bf16 %v3154_v35, %v1353_v36  ;;  %v3157_v39 = vld [vmem:[#allocation2 + $0x18] sm:$0xff]  ;;  %v1333_v32 = vpack.c.bf16 %v3154_v35, %v1329_v27  ;;  %v2511_v36 = vld [vmem:[#allocation5 + $0x148] sm:$0xf0] }
 0x30b   : > { %v1358_v41 = vpack.c.bf16 %v3157_v39, %v1354_v40  ;;  %v1334_v28 = vpack.c.bf16 %v3157_v39, %v1330_v26  ;;  %v2501_v40 = vld [vmem:[#allocation5 + $0x130] sm:$0xf] }
 0x30c   : > { %v1383_v42 = vshll.u32 %v1357_v38, 16  ;;  %v1381_v52 = vshrl.u32 %v1357_v38, 16  ;;  %v2514_v38 = vor.u32 %v2687_v34, %v2511_v36 }
 0x30d   : > { %v1395_v47 = vshll.u32 %v1358_v41, 16  ;;  %v1393_v56 = vshrl.u32 %v1358_v41, 16  ;;  %v2686_v41 = vld [vmem:[#allocation5 + $0x134] sm:$0xf0] }
 0x30e   : > { %v1385_v53 = vrot.slane %v1383_v42, 1  ;;  %v2685_v42 = vld [vmem:[#allocation5 + $0x134] sm:$0xf] }
 0x30f   : > { %v1397_v57 = vrot.slane %v1395_v47, 1  ;;  %v2502_v47 = vor.u32 %v2686_v41, %v2501_v40  ;;  %v2506_v49 = vor.u32 %v2685_v42, %v2503_v43 }
 0x310   : > { %v1386_v45 = vor.u32 %v1385_v53, %v1381_v52  ;;  %v1704_v52 = vld [vmem:[#allocation2 + $0x8] sm:$0xfc] }
 0x311   : > { %v1398_v60 = vor.u32 %v1397_v57, %v1393_v56  ;;  %v2684_v53 = vld [vmem:[#allocation5 + $0x124] sm:$0xf0]  ;;  %v1707_v56 = vpack.c.bf16 %v3154_v35, %v1703_v51  ;;  %v1708_v57 = vpack.c.bf16 %v3157_v39, %v1704_v52 }
 0x312   : > { %v1391_v63 = vsel %vm385_vm13, %v1386_v45, %v1390_v59  ;;  %v2494_v16 = vor.u32 %v2684_v53, %v2493_v50  ;;  %v2498_v45 = vor.u32 %v2683_v54, %v2495_v55  ;;  %v1710_v59 = vpack.c.bf16 %v1706_v46, %v1706_v46 }
 0x313   : > { %1506 = vmatmul.bf16.vlgmr.msra.gmra.mxu1 %v1391_v63  ;;  %v1403_v6 = vsel %vm385_vm13, %v1398_v60, %v1402_v0  ;;  %1534 = vmatmul.bf16.vlgmr.msra.gmra.mxu0 %v1391_v63  ;;  %v1734_v60 = vrot.slane %v1707_v56, 1  ;;  %v1737_v0 = vrot.slane %v1708_v57, 1 }
 0x314   : > { %2415 = vmatmul.msk.bf16.vlgmr.msrb.gmra.mxu3 %vm887_vm9, %v1403_v6  ;;  %2416 = vmatmul.msk.bf16.vlgmr.msrb.gmra.mxu2 %vm887_vm9, %v1403_v6 }
 0x315   : > { %1834 = vmatpush.bf16.msra.mxu1 %v2550_v48  ;;  %1862 = vmatpush.bf16.msra.mxu0 %v2554_v61  ;;  %v1735_v48 = vrot.slane %v1709_v58, 1  ;;  %v1738_v61 = vrot.slane %v1710_v59, 1 }
 0x316   : > { %1855 = vmatpush.bf16.msrb.mxu3 %v2558_v4  ;;  %1883 = vmatpush.bf16.msrb.mxu2 %v2562_v5 }
 0x317   : > { %v1736_v62 = vsel %vm580_vm14, %v1734_v60, %v1735_v48  ;;  %v1739_v63 = vsel %vm580_vm14, %v1737_v0, %v1738_v61 }
 0x319   : > { %1835 = vmatpush.bf16.msra.mxu1 %v2542_v7  ;;  %1863 = vmatpush.bf16.msra.mxu0 %v2546_v8 }
 0x31d   : > { %1836 = vmatpush.bf16.msra.mxu1 %v2534_v13  ;;  %1864 = vmatpush.bf16.msra.mxu0 %v2538_v14 }
 0x321   : > { %1837 = vmatpush.bf16.msra.mxu1 %v2526_v20  ;;  %1865 = vmatpush.bf16.msra.mxu0 %v2530_v21  ;;  %v1302_v21 = vld [vmem:[%s3191_s6] sm:$0x3] }
 0x322   : > { %v1895_v26 = vperm.slane %v1302_v21, 0 }
 0x323   : > { %2489 = vmatmul.msk.bf16.vlgmr.msrb.gmra.mxu1 %vm887_vm9, %v1334_v28  ;;  %2490 = vmatmul.msk.bf16.vlgmr.msrb.gmra.mxu0 %vm887_vm9, %v1334_v28 }
 0x324   : > { %1655 = vmatmul.bf16.vlgmr.msra.gmra.mxu3 %v1333_v32  ;;  %1683 = vmatmul.bf16.vlgmr.msra.gmra.mxu2 %v1333_v32  ;;  %v1896_v32 = vperm.slane %v1302_v21, 1 }
 0x325   : > { %1838 = vmatpush.bf16.msra.mxu1 %v2518_v29  ;;  %1866 = vmatpush.bf16.msra.mxu0 %v2522_v30 }
 0x329   : > { %1839 = vmatpush.bf16.msra.mxu1 %v2510_v37  ;;  %1867 = vmatpush.bf16.msra.mxu0 %v2514_v38 }
 0x32d   : > { %1840 = vmatpush.bf16.msra.mxu1 %v2502_v47  ;;  %1868 = vmatpush.bf16.msra.mxu0 %v2506_v49 }
 0x331   : > { %1841 = vmatpush.bf16.msra.mxu1 %v2494_v16  ;;  %1869 = vmatpush.bf16.msra.mxu0 %v2498_v45 }
 0x334   : > { %1842 = vmatmul.bf16.vlgmr.msra.gmra.mxu1 %v1736_v62  ;;  %2563 = vmatmul.msk.bf16.vlgmr.msrb.gmra.mxu3 %vm887_vm9, %v1739_v63 }
 0x335   : > { %1870 = vmatmul.bf16.vlgmr.msra.gmra.mxu0 %v1736_v62  ;;  %2564 = vmatmul.msk.bf16.vlgmr.msrb.gmra.mxu2 %vm887_vm9, %v1739_v63 }
 0x390   : > { %v1507_v35 = vpop.f32.mrf.mxu1  ;;  %v1535_v39 = vpop.f32.mrf.mxu0 }
 0x397   : > { %v1521_v1 = vpop.f32.mrf.mxu3  ;;  %v1549_v2 = vpop.f32.mrf.mxu2 }
 0x398   : > { %v1509_v3 = vpop.f32.mrf.mxu1  ;;  %v1537_v4 = vpop.f32.mrf.mxu0  ;;  %v1522_v15 = vadd.f32 %v1521_v1, %v1507_v35  ;;  %v1550_v17 = vadd.f32 %v1549_v2, %v1535_v39 }
 0x39f   : > { %v1523_v5 = vpop.f32.mrf.mxu3  ;;  %v1551_v6 = vpop.f32.mrf.mxu2 }
 0x3a0   : > { %v1670_v7 = vpop.f32.mrf.mxu1  ;;  %v1698_v8 = vpop.f32.mrf.mxu0  ;;  %v1524_v30 = vadd.f32 %v1523_v5, %v1509_v3  ;;  %v1552_v33 = vadd.f32 %v1551_v6, %v1537_v4 }
 0x3a7   : > { %v1656_v9 = vpop.f32.mrf.mxu3  ;;  %v1684_v10 = vpop.f32.mrf.mxu2 }
 0x3a8   : > { %v1672_v11 = vpop.f32.mrf.mxu1  ;;  %v1700_v12 = vpop.f32.mrf.mxu0  ;;  %v1657_v18 = vadd.f32 %v1656_v9, %v1522_v15  ;;  %v1685_v19 = vadd.f32 %v1684_v10, %v1550_v17 }
 0x3aa   : > { %v1671_v24 = vadd.f32 %v1670_v7, %v1657_v18  ;;  %v1699_v28 = vadd.f32 %v1698_v8, %v1685_v19 }
 0x3af   : > { %v1658_v13 = vpop.f32.mrf.mxu3  ;;  %v1686_v14 = vpop.f32.mrf.mxu2 }
 0x3b0   : > { %v1659_v36 = vadd.f32 %v1658_v13, %v1524_v30  ;;  %v1687_v38 = vadd.f32 %v1686_v14, %v1552_v33 }
 0x3b1   : > { %v1843_v20 = vpop.f32.mrf.mxu1 }
 0x3b2   : > { %v1871_v22 = vpop.f32.mrf.mxu0  ;;  %v1673_v44 = vadd.f32 %v1672_v11, %v1659_v36  ;;  %v1701_v51 = vadd.f32 %v1700_v12, %v1687_v38 }
 0x3b7   : > { %v1857_v23 = vpop.f32.mrf.mxu3 }
 0x3b8   : > { %v1858_v25 = vadd.f32 %v1857_v23, %v1843_v20  ;;  %v1885_v27 = vpop.f32.mrf.mxu2 }
 0x3b9   : > { %v1886_v29 = vadd.f32 %v1885_v27, %v1871_v22  ;;  %v1845_v42 = vpop.f32.mrf.mxu1 }
 0x3ba   : > { %v1890_v31 = vadd.f32 %v1858_v25, %v1671_v24  ;;  %v1873_v47 = vpop.f32.mrf.mxu0 }
 0x3bb   : > { %v1891_v34 = vadd.f32 %v1886_v29, %v1699_v28 }
 0x3bc   : > { %v1899_v37 = vadd.f32 %v1895_v26, %v1890_v31 }
 0x3bd   : > { %v1900_v41 = vadd.f32 %v1896_v32, %v1891_v34 }
 0x3be   : > { %v1903_v40 = vmax.f32 %v1899_v37, 0.0 }
 0x3bf   : > { %v1859_v43 = vpop.f32.mrf.mxu3 }
 0x3c0   : > { %v1905_v46 = vadd.f32 %v1903_v40, %v1900_v41  ;;  %v1860_v49 = vadd.f32 %v1859_v43, %v1845_v42  ;;  %v1887_v50 = vpop.f32.mrf.mxu2 }
 0x3c1   : > { %v1888_v52 = vadd.f32 %v1887_v50, %v1873_v47 }
 0x3c2   : > { %v1907_v53 = vmax.f32 %v1905_v46, 0.0  ;;  %v1892_v54 = vadd.f32 %v1860_v49, %v1673_v44 }
 0x3c3   : > { %v1893_v55 = vadd.f32 %v1888_v52, %v1701_v51 }
 0x3c4   : > { %1909 = vst [vmem:[%s312_s11] sm:$0xff] %v1907_v53  ;;  %v1901_v56 = vadd.f32 %v1895_v26, %v1892_v54 }
 0x3c5   : > { %v1902_v58 = vadd.f32 %v1896_v32, %v1893_v55 }
 0x3c6   : > { %v1904_v57 = vmax.f32 %v1901_v56, 0.0 }
 0x3c8   : > { %v1906_v16 = vadd.f32 %v1904_v57, %v1902_v58 }
 0x3ca   : > { %v1908_v45 = vmax.f32 %v1906_v16, 0.0 }
 0x3cc   : > { %1910 = vst [vmem:[%s312_s11 + $0x8] sm:$0xff] %v1908_v45 }
 0x3cd PF: > { %s19_s24 = sadd.s32 1, %s2809_s24  }
 0x3ce   : > { %p16_p7 = scmp.ge.s32.totalorder %s19_s24, 4  }
 0x3d0   :  { %18 = sbr.rel (!%p16_p7) target bundleno = 2 (0x2), region = 94 }
 0x3d5   :  { %1932 = vsyncpa [#allocation4], 1 }
 0x3d6   :  { %1934 = vsyncpa [#allocation4 + $0x1], 1 }
 0x3d7   :  { %1935 = vsyncpa [#allocation6], 1 }

</bundles_post_ra>
